<compile_context>
chip_gen: v6e
topology: v6e:2x2x1
jax: 0.10.0
libtpu: 0.0.40
codegen_flags: <defaults>
</compile_context>

<pallas_src>
import numpy as np
import jax
import jax.numpy as jnp
from jax.experimental import pallas as pl
from jax.experimental.pallas import tpu as pltpu

# ----------------------------- configuration --------------------------------
HIDDEN = 32
AGENT_ATTR = 16
MAP_ATTR = 12
TL_ATTR = 8
N_STEP_HIST = 4
N_PL_NODE = 4
N_SCENE = 2
N_TARGET = 2
N_OTHER = 3
N_MAP = 3
N_TL = 2
N_LAYER_MLP = 2
N_LAYER_TF = 1
N_HEAD = 2
HEAD_DIM = HIDDEN // N_HEAD
D_FF = HIDDEN * 4
LN_EPS = 1e-5
NEG_INF = -1e9  # finite large-negative; driver guarantees >=1 valid key per sequence

CLASS_ORDER = ("target", "other", "tl", "map")   # matches torch.cat order in the module
DIN_PAD = max(AGENT_ATTR, MAP_ATTR, TL_ATTR)     # 16: common padded attr width
DIN_PACK = DIN_PAD + 2                           # +valid column, +batch-id column


def token_counts(n_batch):
    """(n_tokens, real_din, seq_len) per class for the flattened [B*seq, din] layout."""
    return {
        "target": (n_batch * N_STEP_HIST, AGENT_ATTR, N_STEP_HIST),
        "other": (n_batch * N_OTHER * N_STEP_HIST, AGENT_ATTR, N_OTHER * N_STEP_HIST),
        "tl": (n_batch * N_STEP_HIST * N_TL, TL_ATTR, N_STEP_HIST * N_TL),
        "map": (n_batch * N_MAP * N_PL_NODE, MAP_ATTR, N_MAP * N_PL_NODE),
    }


def compute_n_pad(n_batch):
    m = max(c[0] for c in token_counts(n_batch).values())
    return ((m + 7) // 8) * 8


# ------------------------------ kernel helpers -------------------------------
def _layernorm(h, g, b):
    mu = jnp.mean(h, axis=-1, keepdims=True)
    var = jnp.mean((h - mu) * (h - mu), axis=-1, keepdims=True)
    return (h - mu) * jax.lax.rsqrt(var + LN_EPS) * g + b


def make_fused_kernel(n_tf: int):
    """One grid step = one token class: 2-layer MLP -> mask-fill -> +PE -> n_tf x
    post-norm TransformerBlock (MHSA with block-diagonal + key-padding bias, then FFN).

    vec slab layout (rows x 128 lanes), per class:
      0..5 : b1, g1, be1, b2, g2, be2            (MLP biases / LayerNorm affine, lanes 0:32)
      per TF layer l, base = 6 + 8*l:
        +0 bqkv (lanes 0:96, q part pre-scaled)  +1 b1_ffn (lanes 0:128)
        +2 b_o   +3 ln1_g  +4 ln1_b  +5 b2_ffn  +6 ln2_g  +7 ln2_b   (lanes 0:32)
    """

    def kernel(x_ref, aux_ref, pe_ref, vec_ref, w1_ref, w2_ref,
               wqkv_ref, wo_ref, w1f_ref, w2f_ref, o_ref):
        x = x_ref[...]                                  # (N, DIN_PACK)
        attr = x[:, :DIN_PAD]                           # (N, 16) zero-padded attrs
        vcol = x[:, DIN_PAD:DIN_PAD + 1]                # (N, 1)   1.0 = valid
        bidc = x[:, DIN_PAD + 1:DIN_PAD + 2]            # (N, 1)   flattened batch id (-1 = pad)
        aux = aux_ref[...]                              # (2, N)
        vrow = aux[0:1, :]                              # (1, N)
        bidr = aux[1:2, :]                              # (1, N)
        vec = vec_ref[...]                              # (6 + 8*n_tf, 128)

        # ---- fused 2-layer MLP: (Linear -> LayerNorm -> ReLU) x 2 ----
        h = jnp.dot(attr, w1_ref[...], preferred_element_type=jnp.float32) + vec[0:1, :HIDDEN]
        h = _layernorm(h, vec[1:2, :HIDDEN], vec[2:3, :HIDDEN])
        h = jnp.maximum(h, 0.0)
        h = jnp.dot(h, w2_ref[...], preferred_element_type=jnp.float32) + vec[3:4, :HIDDEN]
        h = _layernorm(h, vec[4:5, :HIDDEN], vec[5:6, :HIDDEN])
        h = jnp.maximum(h, 0.0)
        # masked_fill(~valid, 0) THEN learned-PE add (matches PyTorch order)
        h = h * vcol + pe_ref[...]

        # ---- attention bias: same flattened batch element AND key is valid ----
        allowed = (bidc == bidr) & (vrow > 0.5)         # (N, N)
        bias = jnp.where(allowed, 0.0, NEG_INF).astype(jnp.float32)

        # ---- post-norm transformer blocks ----
        for li in range(n_tf):
            base = 6 + 8 * li
            wqkv = wqkv_ref[li]                         # (H, 3H), q columns pre-scaled
            wo = wo_ref[li]                             # (H, H)

            qkv = jnp.dot(h, wqkv, preferred_element_type=jnp.float32) + vec[base:base + 1, :3 * HIDDEN]
            attn = vec[base + 2:base + 3, :HIDDEN]      # b_o, broadcasts below
            for hh in range(N_HEAD):
                lo = hh * HEAD_DIM
                qh = qkv[:, lo:lo + HEAD_DIM]
                kh = qkv[:, HIDDEN + lo:HIDDEN + lo + HEAD_DIM]
                vh = qkv[:, 2 * HIDDEN + lo:2 * HIDDEN + lo + HEAD_DIM]
                # contract last axes directly (no kh.T transpose); scale folded into wq
                s = jax.lax.dot_general(qh, kh, (((1,), (1,)), ((), ())),
                                        preferred_element_type=jnp.float32)
                s = s + bias
                p = jnp.exp(s - jnp.max(s, axis=-1, keepdims=True))
                p = p * pl.reciprocal(jnp.sum(p, axis=-1, keepdims=True), approx=True)
                ho = jnp.dot(p, vh, preferred_element_type=jnp.float32)       # (N, HD)
                # fold head concat into the output projection via W_o row slices
                attn = attn + jnp.dot(ho, wo[lo:lo + HEAD_DIM, :],
                                      preferred_element_type=jnp.float32)

            y = _layernorm(h + attn, vec[base + 3:base + 4, :HIDDEN],
                           vec[base + 4:base + 5, :HIDDEN])                   # residual + LN1
            f = jnp.maximum(jnp.dot(y, w1f_ref[li], preferred_element_type=jnp.float32)
                            + vec[base + 1:base + 2, :D_FF], 0.0)
            f = jnp.dot(f, w2f_ref[li], preferred_element_type=jnp.float32) + vec[base + 5:base + 6, :HIDDEN]
            h = _layernorm(y + f, vec[base + 6:base + 7, :HIDDEN],
                           vec[base + 7:base + 8, :HIDDEN])                   # residual + LN2

        o_ref[...] = h.astype(o_ref.dtype)

    return kernel


# ------------------------------ parameter init -------------------------------
def init_linear(key, din, dout):
    k1, k2 = jax.random.split(key)
    w = jax.random.normal(k1, (din, dout), jnp.float32) * (1.0 / np.sqrt(din))
    b = jax.random.normal(k2, (1, dout), jnp.float32) * 0.01
    return w, b


def init_mlp(key, din, hidden, n_layer):
    dims = [din] + [hidden] * n_layer
    layers = []
    for i in range(n_layer):
        key, k = jax.random.split(key)
        w, b = init_linear(k, dims[i], dims[i + 1])
        layers.append((w, b, jnp.ones((1, dims[i + 1]), jnp.float32),
                       jnp.zeros((1, dims[i + 1]), jnp.float32)))
    return layers


def init_tf(key, h, dff):
    ks = jax.random.split(key, 6)
    wq, bq = init_linear(ks[0], h, h)
    wk, bk = init_linear(ks[1], h, h)
    wv, bv = init_linear(ks[2], h, h)
    wo, bo = init_linear(ks[3], h, h)
    w1, b1 = init_linear(ks[4], h, dff)
    w2, b2 = init_linear(ks[5], dff, h)
    ones = jnp.ones((1, h), jnp.float32)
    zeros = jnp.zeros((1, h), jnp.float32)
    return dict(wq=wq, wk=wk, wv=wv, wo=wo, bq=bq, bk=bk, bv=bv, bo=bo,
                ln1g=ones, ln1b=zeros, w1=w1, b1=b1, w2=w2, b2=b2,
                ln2g=ones, ln2b=zeros)


def init_params(key):
    ks = jax.random.split(key, 12)
    # learned PE (module inits to zeros; small random keeps the add-path exercised)
    pe_target = jax.random.normal(ks[0], (1, N_STEP_HIST, HIDDEN), jnp.float32) * 0.02
    pe_other = jax.random.normal(ks[1], (1, 1, N_STEP_HIST, HIDDEN), jnp.float32) * 0.02
    pe_map = jax.random.normal(ks[2], (1, 1, N_PL_NODE, HIDDEN), jnp.float32) * 0.02
    pe_tl = jax.random.normal(ks[3], (1, N_STEP_HIST, 1, HIDDEN), jnp.float32) * 0.02
    return dict(
        fc_tl=init_mlp(ks[4], TL_ATTR, HIDDEN, N_LAYER_MLP),
        fc_target=init_mlp(ks[5], AGENT_ATTR, HIDDEN, N_LAYER_MLP),
        fc_other=init_mlp(ks[6], AGENT_ATTR, HIDDEN, N_LAYER_MLP),
        fc_map=init_mlp(ks[7], MAP_ATTR, HIDDEN, N_LAYER_MLP),
        pe_target=pe_target, pe_other=pe_other, pe_map=pe_map, pe_tl=pe_tl,
        tf_tl=[init_tf(ks[8], HIDDEN, D_FF) for _ in range(N_LAYER_TF)],
        tf_map=[init_tf(ks[9], HIDDEN, D_FF) for _ in range(N_LAYER_TF)],
        tf_other=[init_tf(ks[10], HIDDEN, D_FF) for _ in range(N_LAYER_TF)],
        tf_target=[init_tf(ks[11], HIDDEN, D_FF) for _ in range(N_LAYER_TF)],
    )


# ---------------------- one-time packing / PE broadcast -----------------------
def _pad_lane(v, width=128):
    return jnp.pad(v, ((0, 0), (0, width - v.shape[1])))


def prepare_params(params, n_batch):
    """One-time weight packing (class-stacked slabs, lane-padded vector slab,
    q-scale folding) + learned-PE broadcast to the padded per-token layout."""
    n_pad = compute_n_pad(n_batch)
    scale = 1.0 / float(np.sqrt(HEAD_DIM))

    def pack_class(mlp_layers, tf_blocks, pe_param, pe_full_shape, din):
        (w1, b1, g1, be1), (w2, b2, g2, be2) = mlp_layers
        w1p = jnp.zeros((DIN_PAD, HIDDEN), jnp.float32).at[:din].set(w1)
        rows = [b1, g1, be1, b2, g2, be2]
        wqkv_l, wo_l, w1f_l, w2f_l = [], [], [], []
        for p in tf_blocks:
            # fold 1/sqrt(head_dim) into q projection (weights + bias)
            wqkv_l.append(jnp.concatenate([p["wq"] * scale, p["wk"], p["wv"]], axis=1))
            wo_l.append(p["wo"])
            w1f_l.append(p["w1"])
            w2f_l.append(p["w2"])
            bqkv = jnp.concatenate([p["bq"] * scale, p["bk"], p["bv"]], axis=1)
            rows += [bqkv, p["b1"], p["bo"], p["ln1g"], p["ln1b"],
                     p["b2"], p["ln2g"], p["ln2b"]]
        vec = jnp.concatenate([_pad_lane(r) for r in rows], axis=0)   # (6 + 8L, 128)
        pe_tok = jnp.broadcast_to(pe_param, pe_full_shape).reshape(-1, HIDDEN)
        pe_tok = jnp.zeros((n_pad, HIDDEN), jnp.float32).at[:pe_tok.shape[0]].set(pe_tok)
        return dict(w1=w1p, w2=w2, vec=vec, pe=pe_tok,
                    wqkv=jnp.stack(wqkv_l), wo=jnp.stack(wo_l),
                    w1f=jnp.stack(w1f_l), w2f=jnp.stack(w2f_l))

    per_class = dict(
        target=pack_class(params["fc_target"], params["tf_target"], params["pe_target"],
                          (n_batch, N_STEP_HIST, HIDDEN), AGENT_ATTR),
        other=pack_class(params["fc_other"], params["tf_other"], params["pe_other"],
                         (n_batch, N_OTHER, N_STEP_HIST, HIDDEN), AGENT_ATTR),
        tl=pack_class(params["fc_tl"], params["tf_tl"], params["pe_tl"],
                      (n_batch, N_STEP_HIST, N_TL, HIDDEN), TL_ATTR),
        map=pack_class(params["fc_map"], params["tf_map"], params["pe_map"],
                       (n_batch, N_MAP, N_PL_NODE, HIDDEN), MAP_ATTR),
    )
    prep = {}
    for k in per_class[CLASS_ORDER[0]]:
        prep[k] = jnp.stack([per_class[name][k] for name in CLASS_ORDER], axis=0)
    return prep


# ------------------------------ forward pass ---------------------------------
@jax.jit
def intra_class_encoder_forward(prep, target_valid, target_attr, other_valid, other_attr,
                                map_valid, map_attr, tl_valid, tl_attr):
    S, T = target_valid.shape[:2]
    B = S * T
    counts = token_counts(B)
    n_pad = prep["pe"].shape[1]
    n_tf = prep["wqkv"].shape[1]
    n_cls = len(CLASS_ORDER)

    attrs = {"target": target_attr, "other": other_attr, "tl": tl_attr, "map": map_attr}
    valids = {"target": target_valid, "other": other_valid, "tl": tl_valid, "map": map_valid}

    xs, auxs = [], []
    for name in CLASS_ORDER:
        n_tok, din, seq = counts[name]
        assert n_tok <= n_pad
        a = attrs[name].reshape(n_tok, din).astype(jnp.float32)
        a = jnp.pad(a, ((0, n_pad - n_tok), (0, DIN_PAD - din)))
        v = jnp.pad(valids[name].reshape(n_tok).astype(jnp.float32), (0, n_pad - n_tok))
        # static flattened-batch ids (compile-time constants); -1 sentinel on padded rows
        bid = jnp.asarray(np.concatenate([
            np.repeat(np.arange(B, dtype=np.float32), seq),
            np.full(n_pad - n_tok, -1.0, np.float32)]))
        xs.append(jnp.concatenate([a, v[:, None], bid[:, None]], axis=1))   # (n_pad, DIN_PACK)
        auxs.append(jnp.stack([v, bid], axis=0))                            # (2, n_pad)
    x_all = jnp.stack(xs)      # (4, n_pad, DIN_PACK)
    aux_all = jnp.stack(auxs)  # (4, 2, n_pad)

    out = pl.pallas_call(
        make_fused_kernel(n_tf),
        out_shape=jax.ShapeDtypeStruct((n_cls, n_pad, HIDDEN), jnp.float32),
        grid=(n_cls,),
        in_specs=[
            pl.BlockSpec((None, n_pad, DIN_PACK), lambda c: (c, 0, 0)),
            pl.BlockSpec((None, 2, n_pad), lambda c: (c, 0, 0)),
            pl.BlockSpec((None, n_pad, HIDDEN), lambda c: (c, 0, 0)),
            pl.BlockSpec((None, prep["vec"].shape[1], 128), lambda c: (c, 0, 0)),
            pl.BlockSpec((None, DIN_PAD, HIDDEN), lambda c: (c, 0, 0)),
            pl.BlockSpec((None, HIDDEN, HIDDEN), lambda c: (c, 0, 0)),
            pl.BlockSpec((None, n_tf, HIDDEN, 3 * HIDDEN), lambda c: (c, 0, 0, 0)),
            pl.BlockSpec((None, n_tf, HIDDEN, HIDDEN), lambda c: (c, 0, 0, 0)),
            pl.BlockSpec((None, n_tf, HIDDEN, D_FF), lambda c: (c, 0, 0, 0)),
            pl.BlockSpec((None, n_tf, D_FF, HIDDEN), lambda c: (c, 0, 0, 0)),
        ],
        out_specs=pl.BlockSpec((None, n_pad, HIDDEN), lambda c: (c, 0, 0)),
        compiler_params=pltpu.CompilerParams(dimension_semantics=("parallel",)),
    )(x_all, aux_all, prep["pe"], prep["vec"], prep["w1"], prep["w2"],
      prep["wqkv"], prep["wo"], prep["w1f"], prep["w2f"])

    embs, vflags = [], []
    for ci, name in enumerate(CLASS_ORDER):
        n_tok, _, seq = counts[name]
        embs.append(out[ci, :n_tok].reshape(B, seq, HIDDEN))
        vflags.append(valids[name].reshape(B, seq))
    emb = jnp.concatenate(embs, axis=1)
    emb_invalid = ~jnp.concatenate(vflags, axis=1)
    return emb, emb_invalid


# ----------------------------------- main -------------------------------------
if __name__ == "__main__":
    key = jax.random.PRNGKey(0)
    kp, kd = jax.random.split(key)
    params = init_params(kp)
    prep = prepare_params(params, N_SCENE * N_TARGET)

    ks = jax.random.split(kd, 8)
    target_attr = jax.random.normal(ks[0], (N_SCENE, N_TARGET, N_STEP_HIST, AGENT_ATTR), jnp.float32)
    other_attr = jax.random.normal(ks[1], (N_SCENE, N_TARGET, N_OTHER, N_STEP_HIST, AGENT_ATTR), jnp.float32)
    map_attr = jax.random.normal(ks[2], (N_SCENE, N_TARGET, N_MAP, N_PL_NODE, MAP_ATTR), jnp.float32)
    tl_attr = jax.random.normal(ks[3], (N_SCENE, N_TARGET, N_STEP_HIST, N_TL, TL_ATTR), jnp.float32)

    def make_valid(k, shape):
        v = jax.random.bernoulli(k, 0.85, shape)
        return v.at[..., :1].set(True)   # guarantee at least one valid key per sequence

    target_valid = make_valid(ks[4], (N_SCENE, N_TARGET, N_STEP_HIST))
    other_valid = make_valid(ks[5], (N_SCENE, N_TARGET, N_OTHER, N_STEP_HIST))
    map_valid = make_valid(ks[6], (N_SCENE, N_TARGET, N_MAP, N_PL_NODE))
    tl_valid = make_valid(ks[7], (N_SCENE, N_TARGET, N_STEP_HIST, N_TL))

    emb, emb_invalid = intra_class_encoder_forward(
        prep, target_valid, target_attr, other_valid, other_attr,
        map_valid, map_attr, tl_valid, tl_attr)
    jax.block_until_ready((emb, emb_invalid))

    n_emb_expected = N_STEP_HIST + N_OTHER * N_STEP_HIST + N_STEP_HIST * N_TL + N_MAP * N_PL_NODE
    assert emb.shape == (N_SCENE * N_TARGET, n_emb_expected, HIDDEN), emb.shape
    assert emb_invalid.shape == (N_SCENE * N_TARGET, n_emb_expected), emb_invalid.shape
    assert emb_invalid.dtype == jnp.bool_
    assert bool(jnp.all(jnp.isfinite(emb)))
    print("KERNEL_OK")
</pallas_src>

<mosaic_0001>
module attributes {stable_mosaic.version = 11 : i64} {
  func.func @kernel(%arg0: i32, %arg1: memref<1x48x18xf32, #tpu.memory_space<vmem>>, %arg2: memref<1x2x48xf32, #tpu.memory_space<vmem>>, %arg3: memref<1x48x32xf32, #tpu.memory_space<vmem>>, %arg4: memref<1x14x128xf32, #tpu.memory_space<vmem>>, %arg5: memref<1x16x32xf32, #tpu.memory_space<vmem>>, %arg6: memref<1x32x32xf32, #tpu.memory_space<vmem>>, %arg7: memref<1x1x32x96xf32, #tpu.memory_space<vmem>>, %arg8: memref<1x1x32x32xf32, #tpu.memory_space<vmem>>, %arg9: memref<1x1x32x128xf32, #tpu.memory_space<vmem>>, %arg10: memref<1x1x128x32xf32, #tpu.memory_space<vmem>>, %arg11: memref<1x48x32xf32, #tpu.memory_space<vmem>>) attributes {dimension_semantics = [#tpu.dimension_semantics<parallel>], iteration_bounds = array<i64: 4>, scalar_prefetch = 0 : i64, scratch_operands = 0 : i64, tpu.core_type = #tpu.core_type<tc>, window_params = [{transform_indices = @transform_0, window_bounds = array<i64: 1, 48, 18>}, {transform_indices = @transform_1, window_bounds = array<i64: 1, 2, 48>}, {transform_indices = @transform_2, window_bounds = array<i64: 1, 48, 32>}, {transform_indices = @transform_3, window_bounds = array<i64: 1, 14, 128>}, {transform_indices = @transform_4, window_bounds = array<i64: 1, 16, 32>}, {transform_indices = @transform_5, window_bounds = array<i64: 1, 32, 32>}, {transform_indices = @transform_6, window_bounds = array<i64: 1, 1, 32, 96>}, {transform_indices = @transform_7, window_bounds = array<i64: 1, 1, 32, 32>}, {transform_indices = @transform_8, window_bounds = array<i64: 1, 1, 32, 128>}, {transform_indices = @transform_9, window_bounds = array<i64: 1, 1, 128, 32>}, {transform_indices = @transform_10, window_bounds = array<i64: 1, 48, 32>}]} {
    %c0 = arith.constant 0 : index
    %c0_0 = arith.constant 0 : index
    %c0_1 = arith.constant 0 : index
    %0 = vector.load %arg1[%c0, %c0_0, %c0_1] : memref<1x48x18xf32, #tpu.memory_space<vmem>>, vector<1x48x18xf32>
    %1 = vector.shape_cast %0 : vector<1x48x18xf32> to vector<48x18xf32>
    %2 = vector.extract_strided_slice %1 {offsets = [0, 0], sizes = [48, 16], strides = [1, 1]} : vector<48x18xf32> to vector<48x16xf32>
    %3 = vector.extract_strided_slice %1 {offsets = [0, 16], sizes = [48, 1], strides = [1, 1]} : vector<48x18xf32> to vector<48x1xf32>
    %4 = vector.extract_strided_slice %1 {offsets = [0, 17], sizes = [48, 1], strides = [1, 1]} : vector<48x18xf32> to vector<48x1xf32>
    %c0_2 = arith.constant 0 : index
    %c0_3 = arith.constant 0 : index
    %c0_4 = arith.constant 0 : index
    %5 = vector.load %arg2[%c0_2, %c0_3, %c0_4] : memref<1x2x48xf32, #tpu.memory_space<vmem>>, vector<1x2x48xf32>
    %6 = vector.shape_cast %5 : vector<1x2x48xf32> to vector<2x48xf32>
    %7 = vector.extract_strided_slice %6 {offsets = [0, 0], sizes = [1, 48], strides = [1, 1]} : vector<2x48xf32> to vector<1x48xf32>
    %8 = vector.extract_strided_slice %6 {offsets = [1, 0], sizes = [1, 48], strides = [1, 1]} : vector<2x48xf32> to vector<1x48xf32>
    %c0_5 = arith.constant 0 : index
    %c0_6 = arith.constant 0 : index
    %c0_7 = arith.constant 0 : index
    %9 = vector.load %arg4[%c0_5, %c0_6, %c0_7] : memref<1x14x128xf32, #tpu.memory_space<vmem>>, vector<1x14x128xf32>
    %10 = vector.shape_cast %9 : vector<1x14x128xf32> to vector<14x128xf32>
    %c0_8 = arith.constant 0 : index
    %c0_9 = arith.constant 0 : index
    %c0_10 = arith.constant 0 : index
    %11 = vector.load %arg5[%c0_8, %c0_9, %c0_10] : memref<1x16x32xf32, #tpu.memory_space<vmem>>, vector<1x16x32xf32>
    %12 = vector.shape_cast %11 : vector<1x16x32xf32> to vector<16x32xf32>
    %cst = arith.constant dense<0.000000e+00> : vector<48x32xf32>
    %13 = tpu.matmul %2, %12, %cst {dimension_numbers = #tpu.dot_dimension_numbers<[1], [0], [0], [1], [0, 0, 1, 1], [], []>} : vector<48x16xf32>, vector<16x32xf32>, vector<48x32xf32> -> vector<48x32xf32>
    %14 = vector.extract_strided_slice %10 {offsets = [0, 0], sizes = [1, 32], strides = [1, 1]} : vector<14x128xf32> to vector<1x32xf32>
    %15 = vector.broadcast %14 : vector<1x32xf32> to vector<48x32xf32>
    %16 = arith.addf %13, %15 : vector<48x32xf32>
    %17 = vector.extract_strided_slice %10 {offsets = [1, 0], sizes = [1, 32], strides = [1, 1]} : vector<14x128xf32> to vector<1x32xf32>
    %18 = vector.extract_strided_slice %10 {offsets = [2, 0], sizes = [1, 32], strides = [1, 1]} : vector<14x128xf32> to vector<1x32xf32>
    %cst_11 = arith.constant dense<0.000000e+00> : vector<48xf32>
    %19 = vector.multi_reduction <add>, %16, %cst_11 [1] : vector<48x32xf32> to vector<48xf32>
    %20 = vector.shape_cast %19 : vector<48xf32> to vector<48x1xf32>
    %cst_12 = arith.constant 3.200000e+01 : f32
    %21 = vector.broadcast %cst_12 : f32 to vector<48x1xf32>
    %22 = arith.divf %20, %21 : vector<48x1xf32>
    %23 = vector.broadcast %22 : vector<48x1xf32> to vector<48x32xf32>
    %24 = arith.subf %16, %23 : vector<48x32xf32>
    %25 = vector.broadcast %22 : vector<48x1xf32> to vector<48x32xf32>
    %26 = arith.subf %16, %25 : vector<48x32xf32>
    %27 = arith.mulf %24, %26 : vector<48x32xf32>
    %cst_13 = arith.constant dense<0.000000e+00> : vector<48xf32>
    %28 = vector.multi_reduction <add>, %27, %cst_13 [1] : vector<48x32xf32> to vector<48xf32>
    %29 = vector.shape_cast %28 : vector<48xf32> to vector<48x1xf32>
    %cst_14 = arith.constant 3.200000e+01 : f32
    %30 = vector.broadcast %cst_14 : f32 to vector<48x1xf32>
    %31 = arith.divf %29, %30 : vector<48x1xf32>
    %32 = vector.broadcast %22 : vector<48x1xf32> to vector<48x32xf32>
    %33 = arith.subf %16, %32 : vector<48x32xf32>
    %cst_15 = arith.constant 9.99999974E-6 : f32
    %34 = vector.broadcast %cst_15 : f32 to vector<48x1xf32>
    %35 = arith.addf %31, %34 : vector<48x1xf32>
    %36 = math.rsqrt %35 : vector<48x1xf32>
    %37 = vector.broadcast %36 : vector<48x1xf32> to vector<48x32xf32>
    %38 = arith.mulf %33, %37 : vector<48x32xf32>
    %39 = vector.broadcast %17 : vector<1x32xf32> to vector<48x32xf32>
    %40 = arith.mulf %38, %39 : vector<48x32xf32>
    %41 = vector.broadcast %18 : vector<1x32xf32> to vector<48x32xf32>
    %42 = arith.addf %40, %41 : vector<48x32xf32>
    %cst_16 = arith.constant 0.000000e+00 : f32
    %43 = vector.broadcast %cst_16 : f32 to vector<48x32xf32>
    %44 = arith.maximumf %42, %43 : vector<48x32xf32>
    %c0_17 = arith.constant 0 : index
    %c0_18 = arith.constant 0 : index
    %c0_19 = arith.constant 0 : index
    %45 = vector.load %arg6[%c0_17, %c0_18, %c0_19] : memref<1x32x32xf32, #tpu.memory_space<vmem>>, vector<1x32x32xf32>
    %46 = vector.shape_cast %45 : vector<1x32x32xf32> to vector<32x32xf32>
    %cst_20 = arith.constant dense<0.000000e+00> : vector<48x32xf32>
    %47 = tpu.matmul %44, %46, %cst_20 {dimension_numbers = #tpu.dot_dimension_numbers<[1], [0], [0], [1], [0, 0, 1, 1], [], []>} : vector<48x32xf32>, vector<32x32xf32>, vector<48x32xf32> -> vector<48x32xf32>
    %48 = vector.extract_strided_slice %10 {offsets = [3, 0], sizes = [1, 32], strides = [1, 1]} : vector<14x128xf32> to vector<1x32xf32>
    %49 = vector.broadcast %48 : vector<1x32xf32> to vector<48x32xf32>
    %50 = arith.addf %47, %49 : vector<48x32xf32>
    %51 = vector.extract_strided_slice %10 {offsets = [4, 0], sizes = [1, 32], strides = [1, 1]} : vector<14x128xf32> to vector<1x32xf32>
    %52 = vector.extract_strided_slice %10 {offsets = [5, 0], sizes = [1, 32], strides = [1, 1]} : vector<14x128xf32> to vector<1x32xf32>
    %cst_21 = arith.constant dense<0.000000e+00> : vector<48xf32>
    %53 = vector.multi_reduction <add>, %50, %cst_21 [1] : vector<48x32xf32> to vector<48xf32>
    %54 = vector.shape_cast %53 : vector<48xf32> to vector<48x1xf32>
    %cst_22 = arith.constant 3.200000e+01 : f32
    %55 = vector.broadcast %cst_22 : f32 to vector<48x1xf32>
    %56 = arith.divf %54, %55 : vector<48x1xf32>
    %57 = vector.broadcast %56 : vector<48x1xf32> to vector<48x32xf32>
    %58 = arith.subf %50, %57 : vector<48x32xf32>
    %59 = vector.broadcast %56 : vector<48x1xf32> to vector<48x32xf32>
    %60 = arith.subf %50, %59 : vector<48x32xf32>
    %61 = arith.mulf %58, %60 : vector<48x32xf32>
    %cst_23 = arith.constant dense<0.000000e+00> : vector<48xf32>
    %62 = vector.multi_reduction <add>, %61, %cst_23 [1] : vector<48x32xf32> to vector<48xf32>
    %63 = vector.shape_cast %62 : vector<48xf32> to vector<48x1xf32>
    %cst_24 = arith.constant 3.200000e+01 : f32
    %64 = vector.broadcast %cst_24 : f32 to vector<48x1xf32>
    %65 = arith.divf %63, %64 : vector<48x1xf32>
    %66 = vector.broadcast %56 : vector<48x1xf32> to vector<48x32xf32>
    %67 = arith.subf %50, %66 : vector<48x32xf32>
    %cst_25 = arith.constant 9.99999974E-6 : f32
    %68 = vector.broadcast %cst_25 : f32 to vector<48x1xf32>
    %69 = arith.addf %65, %68 : vector<48x1xf32>
    %70 = math.rsqrt %69 : vector<48x1xf32>
    %71 = vector.broadcast %70 : vector<48x1xf32> to vector<48x32xf32>
    %72 = arith.mulf %67, %71 : vector<48x32xf32>
    %73 = vector.broadcast %51 : vector<1x32xf32> to vector<48x32xf32>
    %74 = arith.mulf %72, %73 : vector<48x32xf32>
    %75 = vector.broadcast %52 : vector<1x32xf32> to vector<48x32xf32>
    %76 = arith.addf %74, %75 : vector<48x32xf32>
    %cst_26 = arith.constant 0.000000e+00 : f32
    %77 = vector.broadcast %cst_26 : f32 to vector<48x32xf32>
    %78 = arith.maximumf %76, %77 : vector<48x32xf32>
    %79 = vector.broadcast %3 : vector<48x1xf32> to vector<48x32xf32>
    %80 = arith.mulf %78, %79 : vector<48x32xf32>
    %c0_27 = arith.constant 0 : index
    %c0_28 = arith.constant 0 : index
    %c0_29 = arith.constant 0 : index
    %81 = vector.load %arg3[%c0_27, %c0_28, %c0_29] : memref<1x48x32xf32, #tpu.memory_space<vmem>>, vector<1x48x32xf32>
    %82 = vector.shape_cast %81 : vector<1x48x32xf32> to vector<48x32xf32>
    %83 = arith.addf %80, %82 : vector<48x32xf32>
    %84 = vector.broadcast %4 : vector<48x1xf32> to vector<48x48xf32>
    %85 = vector.broadcast %8 : vector<1x48xf32> to vector<48x48xf32>
    %86 = arith.cmpf oeq, %84, %85 : vector<48x48xf32>
    %cst_30 = arith.constant 5.000000e-01 : f32
    %87 = vector.broadcast %cst_30 : f32 to vector<1x48xf32>
    %88 = arith.cmpf ogt, %7, %87 : vector<1x48xf32>
    %89 = vector.broadcast %88 : vector<1x48xi1> to vector<48x48xi1>
    %90 = arith.andi %86, %89 : vector<48x48xi1>
    %cst_31 = arith.constant 0.000000e+00 : f32
    %cst_32 = arith.constant -1.000000e+09 : f32
    %91 = vector.broadcast %cst_31 : f32 to vector<48x48xf32>
    %92 = vector.broadcast %cst_32 : f32 to vector<48x48xf32>
    %93 = arith.select %90, %91, %92 : vector<48x48xi1>, vector<48x48xf32>
    %c0_33 = arith.constant 0 : index
    %c0_34 = arith.constant 0 : index
    %c0_35 = arith.constant 0 : index
    %c0_36 = arith.constant 0 : index
    %94 = vector.load %arg7[%c0_33, %c0_34, %c0_35, %c0_36] : memref<1x1x32x96xf32, #tpu.memory_space<vmem>>, vector<1x1x32x96xf32>
    %95 = vector.shape_cast %94 : vector<1x1x32x96xf32> to vector<32x96xf32>
    %c0_37 = arith.constant 0 : index
    %c0_38 = arith.constant 0 : index
    %c0_39 = arith.constant 0 : index
    %c0_40 = arith.constant 0 : index
    %96 = vector.load %arg8[%c0_37, %c0_38, %c0_39, %c0_40] : memref<1x1x32x32xf32, #tpu.memory_space<vmem>>, vector<1x1x32x32xf32>
    %97 = vector.shape_cast %96 : vector<1x1x32x32xf32> to vector<32x32xf32>
    %cst_41 = arith.constant dense<0.000000e+00> : vector<48x96xf32>
    %98 = tpu.matmul %83, %95, %cst_41 {dimension_numbers = #tpu.dot_dimension_numbers<[1], [0], [0], [1], [0, 0, 1, 1], [], []>} : vector<48x32xf32>, vector<32x96xf32>, vector<48x96xf32> -> vector<48x96xf32>
    %99 = vector.extract_strided_slice %10 {offsets = [6, 0], sizes = [1, 96], strides = [1, 1]} : vector<14x128xf32> to vector<1x96xf32>
    %100 = vector.broadcast %99 : vector<1x96xf32> to vector<48x96xf32>
    %101 = arith.addf %98, %100 : vector<48x96xf32>
    %102 = vector.extract_strided_slice %10 {offsets = [8, 0], sizes = [1, 32], strides = [1, 1]} : vector<14x128xf32> to vector<1x32xf32>
    %103 = vector.extract_strided_slice %101 {offsets = [0, 0], sizes = [48, 16], strides = [1, 1]} : vector<48x96xf32> to vector<48x16xf32>
    %104 = vector.extract_strided_slice %101 {offsets = [0, 32], sizes = [48, 16], strides = [1, 1]} : vector<48x96xf32> to vector<48x16xf32>
    %105 = vector.extract_strided_slice %101 {offsets = [0, 64], sizes = [48, 16], strides = [1, 1]} : vector<48x96xf32> to vector<48x16xf32>
    %cst_42 = arith.constant dense<0.000000e+00> : vector<48x48xf32>
    %106 = tpu.matmul %103, %104, %cst_42 {dimension_numbers = #tpu.dot_dimension_numbers<[1], [1], [0], [0], [0, 0, 1, 0], [], []>} : vector<48x16xf32>, vector<48x16xf32>, vector<48x48xf32> -> vector<48x48xf32>
    %107 = arith.addf %106, %93 : vector<48x48xf32>
    %cst_43 = arith.constant dense<0xFF800000> : vector<48xf32>
    %108 = vector.multi_reduction <maximumf>, %107, %cst_43 [1] : vector<48x48xf32> to vector<48xf32>
    %109 = vector.shape_cast %108 : vector<48xf32> to vector<48x1xf32>
    %110 = vector.broadcast %109 : vector<48x1xf32> to vector<48x48xf32>
    %111 = arith.subf %107, %110 : vector<48x48xf32>
    %112 = math.exp %111 : vector<48x48xf32>
    %cst_44 = arith.constant dense<0.000000e+00> : vector<48xf32>
    %113 = vector.multi_reduction <add>, %112, %cst_44 [1] : vector<48x48xf32> to vector<48xf32>
    %114 = vector.shape_cast %113 : vector<48xf32> to vector<48x1xf32>
    %115 = tpu.reciprocal %114 {approx = true} : vector<48x1xf32> -> vector<48x1xf32>
    %116 = vector.broadcast %115 : vector<48x1xf32> to vector<48x48xf32>
    %117 = arith.mulf %112, %116 : vector<48x48xf32>
    %cst_45 = arith.constant dense<0.000000e+00> : vector<48x16xf32>
    %118 = tpu.matmul %117, %105, %cst_45 {dimension_numbers = #tpu.dot_dimension_numbers<[1], [0], [0], [1], [0, 0, 1, 1], [], []>} : vector<48x48xf32>, vector<48x16xf32>, vector<48x16xf32> -> vector<48x16xf32>
    %119 = vector.extract_strided_slice %97 {offsets = [0, 0], sizes = [16, 32], strides = [1, 1]} : vector<32x32xf32> to vector<16x32xf32>
    %cst_46 = arith.constant dense<0.000000e+00> : vector<48x32xf32>
    %120 = tpu.matmul %118, %119, %cst_46 {dimension_numbers = #tpu.dot_dimension_numbers<[1], [0], [0], [1], [0, 0, 1, 1], [], []>} : vector<48x16xf32>, vector<16x32xf32>, vector<48x32xf32> -> vector<48x32xf32>
    %121 = vector.broadcast %102 : vector<1x32xf32> to vector<48x32xf32>
    %122 = arith.addf %121, %120 : vector<48x32xf32>
    %123 = vector.extract_strided_slice %101 {offsets = [0, 16], sizes = [48, 16], strides = [1, 1]} : vector<48x96xf32> to vector<48x16xf32>
    %124 = vector.extract_strided_slice %101 {offsets = [0, 48], sizes = [48, 16], strides = [1, 1]} : vector<48x96xf32> to vector<48x16xf32>
    %125 = vector.extract_strided_slice %101 {offsets = [0, 80], sizes = [48, 16], strides = [1, 1]} : vector<48x96xf32> to vector<48x16xf32>
    %cst_47 = arith.constant dense<0.000000e+00> : vector<48x48xf32>
    %126 = tpu.matmul %123, %124, %cst_47 {dimension_numbers = #tpu.dot_dimension_numbers<[1], [1], [0], [0], [0, 0, 1, 0], [], []>} : vector<48x16xf32>, vector<48x16xf32>, vector<48x48xf32> -> vector<48x48xf32>
    %127 = arith.addf %126, %93 : vector<48x48xf32>
    %cst_48 = arith.constant dense<0xFF800000> : vector<48xf32>
    %128 = vector.multi_reduction <maximumf>, %127, %cst_48 [1] : vector<48x48xf32> to vector<48xf32>
    %129 = vector.shape_cast %128 : vector<48xf32> to vector<48x1xf32>
    %130 = vector.broadcast %129 : vector<48x1xf32> to vector<48x48xf32>
    %131 = arith.subf %127, %130 : vector<48x48xf32>
    %132 = math.exp %131 : vector<48x48xf32>
    %cst_49 = arith.constant dense<0.000000e+00> : vector<48xf32>
    %133 = vector.multi_reduction <add>, %132, %cst_49 [1] : vector<48x48xf32> to vector<48xf32>
    %134 = vector.shape_cast %133 : vector<48xf32> to vector<48x1xf32>
    %135 = tpu.reciprocal %134 {approx = true} : vector<48x1xf32> -> vector<48x1xf32>
    %136 = vector.broadcast %135 : vector<48x1xf32> to vector<48x48xf32>
    %137 = arith.mulf %132, %136 : vector<48x48xf32>
    %cst_50 = arith.constant dense<0.000000e+00> : vector<48x16xf32>
    %138 = tpu.matmul %137, %125, %cst_50 {dimension_numbers = #tpu.dot_dimension_numbers<[1], [0], [0], [1], [0, 0, 1, 1], [], []>} : vector<48x48xf32>, vector<48x16xf32>, vector<48x16xf32> -> vector<48x16xf32>
    %139 = vector.extract_strided_slice %97 {offsets = [16, 0], sizes = [16, 32], strides = [1, 1]} : vector<32x32xf32> to vector<16x32xf32>
    %cst_51 = arith.constant dense<0.000000e+00> : vector<48x32xf32>
    %140 = tpu.matmul %138, %139, %cst_51 {dimension_numbers = #tpu.dot_dimension_numbers<[1], [0], [0], [1], [0, 0, 1, 1], [], []>} : vector<48x16xf32>, vector<16x32xf32>, vector<48x32xf32> -> vector<48x32xf32>
    %141 = arith.addf %122, %140 : vector<48x32xf32>
    %142 = arith.addf %83, %141 : vector<48x32xf32>
    %143 = vector.extract_strided_slice %10 {offsets = [9, 0], sizes = [1, 32], strides = [1, 1]} : vector<14x128xf32> to vector<1x32xf32>
    %144 = vector.extract_strided_slice %10 {offsets = [10, 0], sizes = [1, 32], strides = [1, 1]} : vector<14x128xf32> to vector<1x32xf32>
    %cst_52 = arith.constant dense<0.000000e+00> : vector<48xf32>
    %145 = vector.multi_reduction <add>, %142, %cst_52 [1] : vector<48x32xf32> to vector<48xf32>
    %146 = vector.shape_cast %145 : vector<48xf32> to vector<48x1xf32>
    %cst_53 = arith.constant 3.200000e+01 : f32
    %147 = vector.broadcast %cst_53 : f32 to vector<48x1xf32>
    %148 = arith.divf %146, %147 : vector<48x1xf32>
    %149 = vector.broadcast %148 : vector<48x1xf32> to vector<48x32xf32>
    %150 = arith.subf %142, %149 : vector<48x32xf32>
    %151 = vector.broadcast %148 : vector<48x1xf32> to vector<48x32xf32>
    %152 = arith.subf %142, %151 : vector<48x32xf32>
    %153 = arith.mulf %150, %152 : vector<48x32xf32>
    %cst_54 = arith.constant dense<0.000000e+00> : vector<48xf32>
    %154 = vector.multi_reduction <add>, %153, %cst_54 [1] : vector<48x32xf32> to vector<48xf32>
    %155 = vector.shape_cast %154 : vector<48xf32> to vector<48x1xf32>
    %cst_55 = arith.constant 3.200000e+01 : f32
    %156 = vector.broadcast %cst_55 : f32 to vector<48x1xf32>
    %157 = arith.divf %155, %156 : vector<48x1xf32>
    %158 = vector.broadcast %148 : vector<48x1xf32> to vector<48x32xf32>
    %159 = arith.subf %142, %158 : vector<48x32xf32>
    %cst_56 = arith.constant 9.99999974E-6 : f32
    %160 = vector.broadcast %cst_56 : f32 to vector<48x1xf32>
    %161 = arith.addf %157, %160 : vector<48x1xf32>
    %162 = math.rsqrt %161 : vector<48x1xf32>
    %163 = vector.broadcast %162 : vector<48x1xf32> to vector<48x32xf32>
    %164 = arith.mulf %159, %163 : vector<48x32xf32>
    %165 = vector.broadcast %143 : vector<1x32xf32> to vector<48x32xf32>
    %166 = arith.mulf %164, %165 : vector<48x32xf32>
    %167 = vector.broadcast %144 : vector<1x32xf32> to vector<48x32xf32>
    %168 = arith.addf %166, %167 : vector<48x32xf32>
    %c0_57 = arith.constant 0 : index
    %c0_58 = arith.constant 0 : index
    %c0_59 = arith.constant 0 : index
    %c0_60 = arith.constant 0 : index
    %169 = vector.load %arg9[%c0_57, %c0_58, %c0_59, %c0_60] : memref<1x1x32x128xf32, #tpu.memory_space<vmem>>, vector<1x1x32x128xf32>
    %170 = vector.shape_cast %169 : vector<1x1x32x128xf32> to vector<32x128xf32>
    %cst_61 = arith.constant dense<0.000000e+00> : vector<48x128xf32>
    %171 = tpu.matmul %168, %170, %cst_61 {dimension_numbers = #tpu.dot_dimension_numbers<[1], [0], [0], [1], [0, 0, 1, 1], [], []>} : vector<48x32xf32>, vector<32x128xf32>, vector<48x128xf32> -> vector<48x128xf32>
    %172 = vector.extract_strided_slice %10 {offsets = [7, 0], sizes = [1, 128], strides = [1, 1]} : vector<14x128xf32> to vector<1x128xf32>
    %173 = vector.broadcast %172 : vector<1x128xf32> to vector<48x128xf32>
    %174 = arith.addf %171, %173 : vector<48x128xf32>
    %cst_62 = arith.constant 0.000000e+00 : f32
    %175 = vector.broadcast %cst_62 : f32 to vector<48x128xf32>
    %176 = arith.maximumf %174, %175 : vector<48x128xf32>
    %c0_63 = arith.constant 0 : index
    %c0_64 = arith.constant 0 : index
    %c0_65 = arith.constant 0 : index
    %c0_66 = arith.constant 0 : index
    %177 = vector.load %arg10[%c0_63, %c0_64, %c0_65, %c0_66] : memref<1x1x128x32xf32, #tpu.memory_space<vmem>>, vector<1x1x128x32xf32>
    %178 = vector.shape_cast %177 : vector<1x1x128x32xf32> to vector<128x32xf32>
    %cst_67 = arith.constant dense<0.000000e+00> : vector<48x32xf32>
    %179 = tpu.matmul %176, %178, %cst_67 {dimension_numbers = #tpu.dot_dimension_numbers<[1], [0], [0], [1], [0, 0, 1, 1], [], []>} : vector<48x128xf32>, vector<128x32xf32>, vector<48x32xf32> -> vector<48x32xf32>
    %180 = vector.extract_strided_slice %10 {offsets = [11, 0], sizes = [1, 32], strides = [1, 1]} : vector<14x128xf32> to vector<1x32xf32>
    %181 = vector.broadcast %180 : vector<1x32xf32> to vector<48x32xf32>
    %182 = arith.addf %179, %181 : vector<48x32xf32>
    %183 = arith.addf %168, %182 : vector<48x32xf32>
    %184 = vector.extract_strided_slice %10 {offsets = [12, 0], sizes = [1, 32], strides = [1, 1]} : vector<14x128xf32> to vector<1x32xf32>
    %185 = vector.extract_strided_slice %10 {offsets = [13, 0], sizes = [1, 32], strides = [1, 1]} : vector<14x128xf32> to vector<1x32xf32>
    %cst_68 = arith.constant dense<0.000000e+00> : vector<48xf32>
    %186 = vector.multi_reduction <add>, %183, %cst_68 [1] : vector<48x32xf32> to vector<48xf32>
    %187 = vector.shape_cast %186 : vector<48xf32> to vector<48x1xf32>
    %cst_69 = arith.constant 3.200000e+01 : f32
    %188 = vector.broadcast %cst_69 : f32 to vector<48x1xf32>
    %189 = arith.divf %187, %188 : vector<48x1xf32>
    %190 = vector.broadcast %189 : vector<48x1xf32> to vector<48x32xf32>
    %191 = arith.subf %183, %190 : vector<48x32xf32>
    %192 = vector.broadcast %189 : vector<48x1xf32> to vector<48x32xf32>
    %193 = arith.subf %183, %192 : vector<48x32xf32>
    %194 = arith.mulf %191, %193 : vector<48x32xf32>
    %cst_70 = arith.constant dense<0.000000e+00> : vector<48xf32>
    %195 = vector.multi_reduction <add>, %194, %cst_70 [1] : vector<48x32xf32> to vector<48xf32>
    %196 = vector.shape_cast %195 : vector<48xf32> to vector<48x1xf32>
    %cst_71 = arith.constant 3.200000e+01 : f32
    %197 = vector.broadcast %cst_71 : f32 to vector<48x1xf32>
    %198 = arith.divf %196, %197 : vector<48x1xf32>
    %199 = vector.broadcast %189 : vector<48x1xf32> to vector<48x32xf32>
    %200 = arith.subf %183, %199 : vector<48x32xf32>
    %cst_72 = arith.constant 9.99999974E-6 : f32
    %201 = vector.broadcast %cst_72 : f32 to vector<48x1xf32>
    %202 = arith.addf %198, %201 : vector<48x1xf32>
    %203 = math.rsqrt %202 : vector<48x1xf32>
    %204 = vector.broadcast %203 : vector<48x1xf32> to vector<48x32xf32>
    %205 = arith.mulf %200, %204 : vector<48x32xf32>
    %206 = vector.broadcast %184 : vector<1x32xf32> to vector<48x32xf32>
    %207 = arith.mulf %205, %206 : vector<48x32xf32>
    %208 = vector.broadcast %185 : vector<1x32xf32> to vector<48x32xf32>
    %209 = arith.addf %207, %208 : vector<48x32xf32>
    %c0_73 = arith.constant 0 : index
    %c0_74 = arith.constant 0 : index
    %c0_75 = arith.constant 0 : index
    %210 = vector.load %arg11[%c0_73, %c0_74, %c0_75] : memref<1x48x32xf32, #tpu.memory_space<vmem>>, vector<1x48x32xf32>
    %211 = vector.shape_cast %210 : vector<1x48x32xf32> to vector<48x32xf32>
    %212 = vector.shape_cast %209 : vector<48x32xf32> to vector<1x48x32xf32>
    tpu.vector_store %arg11[%c0_73, %c0_74, %c0_75], %212 {strides = array<i32>} : memref<1x48x32xf32, #tpu.memory_space<vmem>>, vector<1x48x32xf32>,
    return
  }
  func.func @transform_0(%arg0: i32) -> (i32, i32, i32) {
    %c0_i32 = arith.constant 0 : i32
    %c0_i32_0 = arith.constant 0 : i32
    %c0_i32_1 = arith.constant 0 : i32
    return %arg0, %c0_i32, %c0_i32_0 : i32, i32, i32
  }
  func.func @transform_1(%arg0: i32) -> (i32, i32, i32) {
    %c0_i32 = arith.constant 0 : i32
    %c0_i32_0 = arith.constant 0 : i32
    %c0_i32_1 = arith.constant 0 : i32
    return %arg0, %c0_i32, %c0_i32_0 : i32, i32, i32
  }
  func.func @transform_2(%arg0: i32) -> (i32, i32, i32) {
    %c0_i32 = arith.constant 0 : i32
    %c0_i32_0 = arith.constant 0 : i32
    %c0_i32_1 = arith.constant 0 : i32
    return %arg0, %c0_i32, %c0_i32_0 : i32, i32, i32
  }
  func.func @transform_3(%arg0: i32) -> (i32, i32, i32) {
    %c0_i32 = arith.constant 0 : i32
    %c0_i32_0 = arith.constant 0 : i32
    %c0_i32_1 = arith.constant 0 : i32
    return %arg0, %c0_i32, %c0_i32_0 : i32, i32, i32
  }
  func.func @transform_4(%arg0: i32) -> (i32, i32, i32) {
    %c0_i32 = arith.constant 0 : i32
    %c0_i32_0 = arith.constant 0 : i32
    %c0_i32_1 = arith.constant 0 : i32
    return %arg0, %c0_i32, %c0_i32_0 : i32, i32, i32
  }
  func.func @transform_5(%arg0: i32) -> (i32, i32, i32) {
    %c0_i32 = arith.constant 0 : i32
    %c0_i32_0 = arith.constant 0 : i32
    %c0_i32_1 = arith.constant 0 : i32
    return %arg0, %c0_i32, %c0_i32_0 : i32, i32, i32
  }
  func.func @transform_6(%arg0: i32) -> (i32, i32, i32, i32) {
    %c0_i32 = arith.constant 0 : i32
    %c0_i32_0 = arith.constant 0 : i32
    %c0_i32_1 = arith.constant 0 : i32
    %c0_i32_2 = arith.constant 0 : i32
    return %arg0, %c0_i32, %c0_i32_0, %c0_i32_1 : i32, i32, i32, i32
  }
  func.func @transform_7(%arg0: i32) -> (i32, i32, i32, i32) {
    %c0_i32 = arith.constant 0 : i32
    %c0_i32_0 = arith.constant 0 : i32
    %c0_i32_1 = arith.constant 0 : i32
    %c0_i32_2 = arith.constant 0 : i32
    return %arg0, %c0_i32, %c0_i32_0, %c0_i32_1 : i32, i32, i32, i32
  }
  func.func @transform_8(%arg0: i32) -> (i32, i32, i32, i32) {
    %c0_i32 = arith.constant 0 : i32
    %c0_i32_0 = arith.constant 0 : i32
    %c0_i32_1 = arith.constant 0 : i32
    %c0_i32_2 = arith.constant 0 : i32
    return %arg0, %c0_i32, %c0_i32_0, %c0_i32_1 : i32, i32, i32, i32
  }
  func.func @transform_9(%arg0: i32) -> (i32, i32, i32, i32) {
    %c0_i32 = arith.constant 0 : i32
    %c0_i32_0 = arith.constant 0 : i32
    %c0_i32_1 = arith.constant 0 : i32
    %c0_i32_2 = arith.constant 0 : i32
    return %arg0, %c0_i32, %c0_i32_0, %c0_i32_1 : i32, i32, i32, i32
  }
  func.func @transform_10(%arg0: i32) -> (i32, i32, i32) {
    %c0_i32 = arith.constant 0 : i32
    %c0_i32_0 = arith.constant 0 : i32
    %c0_i32_1 = arith.constant 0 : i32
    return %arg0, %c0_i32, %c0_i32_0 : i32, i32, i32
  }
}

</mosaic_0001>

<bundles_post_ra>
// kernel: squeeze.5
= control target key start
LH: loop header
LB: loop body
LE: loop exit
PB: predicated region body
PF: predicated region fallthrough
CT: control target
= control target key end

     0   :  { %vm3_vm0 = vcmask 261120   ;;  %s98_s0 = inlined_call_operand.vmem [shape: f32[1,48,32], index: 0, kind: input, shape index: {}]   ;;  %s99_s1 = inlined_call_operand.vmem [shape: f32[4,12,32], index: 1, kind: output, shape index: {}]  }
   0x1   :  { %v2_v0 = vld [vmem:[%s98_s0] sm:$0xff]   ;;  %v34_v1 = vld [vmem:[%s98_s0 + $0x8] sm:$0xff]   ;;  %v37_v2 = vld [vmem:[%s98_s0 + $0x10] sm:$0xff]  }
   0x2   :  { %4 = vst.msk [vmem:[%s99_s1] sm:$0xff] %vm3_vm0, %v2_v0   ;;  %35 = vst.msk [vmem:[%s99_s1 + $0x8] sm:$0xf] %vm3_vm0, %v34_v1   ;;  %v39_v3 = vld [vmem:[%s98_s0 + $0x18] sm:$0xff]   ;;  %v41_v4 = vld [vmem:[%s98_s0 + $0x20] sm:$0xff]  }
   0x3   :  { %36 = vst.msk [vmem:[%s99_s1 + $0xc] sm:$0xf0] %vm3_vm0, %v34_v1   ;;  %38 = vst.msk [vmem:[%s99_s1 + $0x14] sm:$0xff] %vm3_vm0, %v37_v2   ;;  %v44_v5 = vld [vmem:[%s98_s0 + $0x28] sm:$0xff]  }
   0x4   :  { %40 = vst.msk [vmem:[%s99_s1 + $0x20] sm:$0xff] %vm3_vm0, %v39_v3   ;;  %42 = vst.msk [vmem:[%s99_s1 + $0x28] sm:$0xf] %vm3_vm0, %v41_v4  }
   0x5   :  { %43 = vst.msk [vmem:[%s99_s1 + $0x2c] sm:$0xf0] %vm3_vm0, %v41_v4   ;;  %45 = vst.msk [vmem:[%s99_s1 + $0x34] sm:$0xff] %vm3_vm0, %v44_v5  }

// kernel: intra_class_encoder_forward.1
= control target key start
LH: loop header
LB: loop body
LE: loop exit
PB: predicated region body
PF: predicated region fallthrough
CT: control target
= control target key end

     0   :  { %s3388_s13 = smov 0   ;;  %s4050_s0 = inlined_call_operand.vmem [shape: f32[4,48,18], index: 0, kind: input, shape index: {}]   ;;  %s4051_s1 = inlined_call_operand.vmem [shape: f32[4,2,48], index: 1, kind: input, shape index: {}]   ;;  %s4052_s2 = inlined_call_operand.vmem [shape: f32[4,48,32], index: 2, kind: input, shape index: {}]   ;;  %s4053_s3 = inlined_call_operand.vmem [shape: f32[4,14,128], index: 3, kind: input, shape index: {}]   ;;  %s4054_s4 = inlined_call_operand.vmem [shape: f32[4,16,32], index: 4, kind: input, shape index: {}]   ;;  %s4055_s5 = inlined_call_operand.vmem [shape: f32[4,32,32], index: 5, kind: input, shape index: {}]   ;;  %s4056_s6 = inlined_call_operand.vmem [shape: f32[4,1,32,96], index: 6, kind: input, shape index: {}]   ;;  %s4057_s7 = inlined_call_operand.vmem [shape: f32[4,1,32,32], index: 7, kind: input, shape index: {}]   ;;  %s4058_s8 = inlined_call_operand.vmem [shape: f32[4,1,32,128], index: 8, kind: input, shape index: {}]   ;;  %s4059_s9 = inlined_call_operand.vmem [shape: f32[4,1,128,32], index: 9, kind: input, shape index: {}]   ;;  %s4060_s10 = inlined_call_operand.vmem [shape: f32[4,48,32], index: 10, kind: output, shape index: {}]  }
   0x1 LB: > { %s2753_s14 = sadd.s32 4294967295, %s3322_s13   ;;  %p2757_p0 = scmp.ge.s32.totalorder %s3322_s13, 1  ;;  %s3322_s13 = sphi %s3388_s13, %s20_s13  }
   0x2   : > { %p401_p1 = scmp.lt.s32.totalorder %s3322_s13, 5 }
   0x4   : > { %p402_p2 = pnand %p2757_p0, %p401_p1 }
   0x5   : > { %p483_p3 = scmp.lt.s32.totalorder (!%p402_p2), %s2753_s14, 3  ;;  %s3327_s19 = smov (!%p402_p2), 80  }
   0x6   : > { %405 = sbr.rel (%p402_p2) target bundleno = 3545 (0xdd9), region = 60  ;;  %s3328_s20 = smov (!%p402_p2), 112  }
   0x7   : > { %s3331_s28 = smov (!%p402_p2), 64  }
   0xb   : > { %v548_v0 = vlaneseq  ;;  %s4064_s14 = smov (!%p483_p3, %s2753_s14), 3  ;;  %vm552_vm0 = vcmask 130048   ;;  %vm666_vm1 = vcmask 261120   ;;  %vm1354_vm10 = vcmask 392192  }
   0xc   : > { %s2850_s15 = sshll.u32 %s4064_s14, 4  ;;  %s3411_s22 = smul.u32 48, %s4064_s14 }
   0xd   : > { %v3399_v1 = vshrl.u32 %v548_v0, 7  ;;  %s506_s18 = scalar_lea.vmem %s4054_s4, %s2850_s15  ;;  %s3407_s21 = scalar_lea.vmem %s4053_s3, %s2850_s15 }
   0xe   : > { %v547_v2 = vld [vmem:[%s506_s18 + $0x8] sm:$0xff]  ;;  %v546_v8 = vld [vmem:[%s506_s18] sm:$0xff]  ;;  %s487_s25 = scalar_lea.vmem %s4050_s0, %s3411_s22  ;;  %s3506_s26 = sshll.u32 %s4064_s14, 5 }
   0xf   : > { %v758_v3 = vsub.s32 2, %v3399_v1  ;;  %v545_v4 = vld [vmem:[%s3407_s21 + $0x8] sm:$0x3f]  ;;  %2981 = vmatprep.subr.mxu0 %v547_v2  ;;  %v778_v5 = vsub.s32 3, %v3399_v1  ;;  %v973_v6 = vsub.s32 4, %v3399_v1  ;;  %v983_v7 = vsub.s32 5, %v3399_v1  ;;  %s511_s29 = scalar_lea.vmem %s4055_s5, %s3506_s26  ;;  %s516_s12 = scalar_lea.vmem %s4056_s6, %s3506_s26 }
  0x10   : > { %2982 = vmatpush3.msra.mxu0 %v547_v2  ;;  %v3437_v13 = vld [vmem:[%s487_s25] sm:$0xff]  ;;  %v3439_v14 = vld [vmem:[%s487_s25 + $0x8] sm:$0xff]  ;;  %v3441_v15 = vld [vmem:[%s487_s25 + $0x10] sm:$0xff]  ;;  %v3462_v19 = vsub.s32 0, %v3399_v1  ;;  %s3595_s17 = scalar_lea.vmem %s4052_s2, %s3411_s22  ;;  %s3326_s18 = smov 96  }
  0x11   : > { %v3419_v9 = vrot.slane %v545_v4, %v758_v3  ;;  %v3427_v10 = vrot.slane %v545_v4, %v778_v5  ;;  %v3431_v11 = vrot.slane %v545_v4, %v973_v6  ;;  %v3435_v12 = vrot.slane %v545_v4, %v983_v7  ;;  %2983 = vmatprep.subr.mxu0 %v546_v8  ;;  %v3449_v16 = vld [vmem:[%s487_s25 + $0x18] sm:$0xff]  ;;  %v3451_v17 = vld [vmem:[%s487_s25 + $0x20] sm:$0xff]  ;;  %v3457_v18 = vld [vmem:[%s487_s25 + $0x28] sm:$0xff]  ;;  %s2759_s23 = sshll.u32 %s4064_s14, 1 }
  0x12   : > { %2984 = vmatpush3.msra.mxu0 %v546_v8  ;;  %2985 = vmatprep.mubr.msk.f32.mxu0 %vm552_vm0, %v3437_v13  ;;  %v3465_v20 = vld [vmem:[%s3407_s21] sm:$0xff]  ;;  %s491_s27 = scalar_lea.vmem %s4051_s1, %s2759_s23 }
  0x13   : > { %2986 = vmatmul.mubr.msk.f32.vlgmr.msra.gmra.mxu0 %vm552_vm0, %v3439_v14  ;;  %v551_v22 = vrot.slane %v3465_v20, %v3462_v19 }
  0x14   : > { %2988 = vmatprep.mubr.msk.f32.mxu0 %vm552_vm0, %v3441_v15 }
  0x17   : > { %2989 = vmatmul.mubr.msk.f32.gmra.mxu0 %vm552_vm0, %v3449_v16 }
  0x18   : > { %2991 = vmatprep.mubr.msk.f32.mxu0 %vm552_vm0, %v3451_v17 }
  0x1b   : > { %2992 = vmatmul.mubr.msk.f32.gmra.mxu0 %vm552_vm0, %v3457_v18 }
  0xd3   : > { %v2987_v21 = vpop.f32.mrf.mxu0 }
  0xd4   : > { %v643_v26 = vadd.f32 %v2987_v21, %v551_v22 }
  0xd5   : > { %v637_v23 = vpop.f32.mrf.mxu0 }
  0xd6   : > { %v638_v24 = vadd.f32 %v637_v23, %v551_v22  ;;  %v670_v33 = vsel %vm666_vm1, %v643_v26, 0.0  ;;  %v775_v23 = vld [vmem:[%s511_s29 + $0x18] sm:$0xff] }
  0xd7   : > { %v2990_v25 = vpop.f32.mrf.mxu0  ;;  %2994 = vmatprep.subr.mxu1 %v775_v23 }
  0xd8   : > { %v667_v27 = vsel %vm666_vm1, %v638_v24, 0.0  ;;  %v653_v31 = vadd.f32 %v2990_v25, %v551_v22  ;;  %2995 = vmatpush3.msra.mxu1 %v775_v23  ;;  %v773_v25 = vld [vmem:[%s511_s29 + $0x8] sm:$0xff] }
  0xd9   : > { %v647_v28 = vpop.f32.mrf.mxu0  ;;  %668 = vadd.xlane.f32.xlu0 %v667_v27 }
  0xda   : > { %v648_v29 = vadd.f32 %v647_v28, %v551_v22  ;;  %v676_v37 = vsel %vm666_vm1, %v653_v31, 0.0 }
  0xdb   : > { %v2993_v30 = vpop.f32.mrf.mxu0 }
  0xdc   : > { %v673_v32 = vsel %vm666_vm1, %v648_v29, 0.0  ;;  %v663_v36 = vadd.f32 %v2993_v30, %v551_v22 }
  0xdd   : > { %v657_v34 = vpop.f32.mrf.mxu0  ;;  %674 = vadd.xlane.f32.xlu1 %v673_v32  ;;  %671 = vadd.xlane.f32.xlu0 %v670_v33 }
  0xde   : > { %v658_v35 = vadd.f32 %v657_v34, %v551_v22  ;;  %v682_v39 = vsel %vm666_vm1, %v663_v36, 0.0 }
  0xe0   : > { %v679_v38 = vsel %vm666_vm1, %v658_v35, 0.0 }
  0xe1   : > { %677 = vadd.xlane.f32.xlu1 %v676_v37  ;;  %680 = vadd.xlane.f32.xlu0 %v679_v38 }
  0xe5   : > { %683 = vadd.xlane.f32.xlu1 %v682_v39 }
 0x162   : > { %v669_v40 = vpop.xlane.xlu0 %668 }
 0x163   : > { %v686_v41 = vmul.f32 0.03125, %v669_v40 }
 0x165   : > { %v3475_v42 = vsub.f32 %v638_v24, %v686_v41  ;;  %v774_v24 = vld [vmem:[%s511_s29 + $0x10] sm:$0xff] }
 0x166   : > { %v675_v43 = vpop.xlane.xlu1 %674  ;;  %v672_v44 = vpop.xlane.xlu0 %671  ;;  %2996 = vmatprep.subr.mxu1 %v774_v24 }
 0x167   : > { %v688_v45 = vmul.f32 0.03125, %v675_v43  ;;  %v687_v46 = vmul.f32 0.03125, %v672_v44  ;;  %v698_v47 = vmul.f32 %v3475_v42, %v3475_v42  ;;  %2997 = vmatpush3.msra.mxu1 %v774_v24  ;;  %v3513_v44 = vsub.s32 1, %v3399_v1 }
 0x168   : > { %2998 = vmatprep.subr.mxu1 %v773_v25 }
 0x169   : > { %v3479_v48 = vsub.f32 %v648_v29, %v688_v45  ;;  %v3481_v49 = vsub.f32 %v643_v26, %v687_v46  ;;  %v704_v50 = vsel %vm666_vm1, %v698_v47, 0.0  ;;  %2999 = vmatpush3.msra.mxu1 %v773_v25  ;;  %v772_v26 = vld [vmem:[%s511_s29] sm:$0xff]  ;;  %v749_v47 = vrot.slane %v3465_v20, %v3513_v44  ;;  %s3332_s29 = smov 48  }
 0x16a   : > { %v678_v51 = vpop.xlane.xlu1 %677  ;;  %705 = vadd.xlane.f32.xlu0 %v704_v50  ;;  %v681_v52 = vpop.xlane.xlu0 %680  ;;  %3000 = vmatprep.subr.mxu1 %v772_v26 }
 0x16b   : > { %v689_v53 = vmul.f32 0.03125, %v678_v51  ;;  %v690_v54 = vmul.f32 0.03125, %v681_v52  ;;  %v700_v55 = vmul.f32 %v3479_v48, %v3479_v48  ;;  %v699_v56 = vmul.f32 %v3481_v49, %v3481_v49  ;;  %3001 = vmatpush3.msra.mxu1 %v772_v26 }
 0x16c   : > { %v759_v51 = vrot.slane %v3465_v20, %v758_v3 }
 0x16d   : > { %v3488_v57 = vsub.f32 %v653_v31, %v689_v53  ;;  %v3490_v58 = vsub.f32 %v658_v35, %v690_v54  ;;  %v710_v59 = vsel %vm666_vm1, %v700_v55, 0.0  ;;  %v707_v60 = vsel %vm666_vm1, %v699_v56, 0.0 }
 0x16e   : > { %v684_v61 = vpop.xlane.xlu1 %683  ;;  %711 = vadd.xlane.f32.xlu0 %v710_v59  ;;  %708 = vadd.xlane.f32.xlu1 %v707_v60 }
 0x16f   : > { %v691_v62 = vmul.f32 0.03125, %v684_v61  ;;  %v701_v63 = vmul.f32 %v3488_v57, %v3488_v57  ;;  %v702_v0 = vmul.f32 %v3490_v58, %v3490_v58 }
 0x171   : > { %v3498_v2 = vsub.f32 %v663_v36, %v691_v62  ;;  %v713_v4 = vsel %vm666_vm1, %v701_v63, 0.0  ;;  %v716_v8 = vsel %vm666_vm1, %v702_v0, 0.0 }
 0x172   : > { %714 = vadd.xlane.f32.xlu1 %v713_v4  ;;  %717 = vadd.xlane.f32.xlu0 %v716_v8 }
 0x173   : > { %v703_v21 = vmul.f32 %v3498_v2, %v3498_v2 }
 0x175   : > { %v719_v22 = vsel %vm666_vm1, %v703_v21, 0.0 }
 0x176   : > { %720 = vadd.xlane.f32.xlu1 %v719_v22 }
 0x1f3   : > { %v706_v27 = vpop.xlane.xlu0 %705 }
 0x1f4   : > { %v722_v28 = vmul.f32 0.03125, %v706_v27 }
 0x1f6   : > { %v728_v29 = vadd.f32 1e-05, %v722_v28 }
 0x1f7   : > { %v709_v30 = vpop.xlane.xlu1 %708  ;;  %v712_v31 = vpop.xlane.xlu0 %711 }
 0x1f8   : > { %3218 = vrsqrt.f32 %v728_v29  ;;  %v723_v32 = vmul.f32 0.03125, %v709_v30  ;;  %v724_v33 = vmul.f32 0.03125, %v712_v31  ;;  %v779_v31 = vrot.slane %v3465_v20, %v778_v5 }
 0x1fa   : > { %v729_v34 = vadd.f32 1e-05, %v723_v32  ;;  %v730_v35 = vadd.f32 1e-05, %v724_v33 }
 0x1fb   : > { %v715_v36 = vpop.xlane.xlu1 %714  ;;  %v718_v37 = vpop.xlane.xlu0 %717 }
 0x1fc   : > { %3220 = vrsqrt.f32 %v729_v34  ;;  %v725_v38 = vmul.f32 0.03125, %v715_v36  ;;  %v726_v39 = vmul.f32 0.03125, %v718_v37 }
 0x1fd   : > { %3222 = vrsqrt.f32 %v730_v35 }
 0x1fe   : > { %v731_v40 = vadd.f32 1e-05, %v725_v38  ;;  %v732_v41 = vadd.f32 1e-05, %v726_v39 }
 0x1ff   : > { %v721_v43 = vpop.xlane.xlu1 %720 }
 0x200   : > { %3224 = vrsqrt.f32 %v731_v40  ;;  %v727_v45 = vmul.f32 0.03125, %v721_v43 }
 0x201   : > { %3226 = vrsqrt.f32 %v732_v41 }
 0x202   : > { %v733_v46 = vadd.f32 1e-05, %v727_v45 }
 0x204   : > { %3228 = vrsqrt.f32 %v733_v46 }
 0x205   : > { %v3219_v50 = vpop.eup %3218 }
 0x206   : > { %v740_v52 = vmul.f32 %v3219_v50, %v3475_v42 }
 0x208   : > { %v750_v53 = vmul.f32 %v749_v47, %v740_v52  ;;  %v3324_v52 = vmov 16  }
 0x209   : > { %v3221_v54 = vpop.eup %3220  ;;  %3215 = vset.pattern.permute.xlu1 %v3324_v52  ;;  %3214 = vset.pattern.permute.xlu0 %v3324_v52 }
 0x20a   : > { %v3223_v55 = vpop.eup %3222  ;;  %v760_v56 = vadd.f32 %v759_v51, %v750_v53  ;;  %v741_v59 = vmul.f32 %v3221_v54, %v3481_v49 }
 0x20b   : > { %v742_v60 = vmul.f32 %v3223_v55, %v3479_v48 }
 0x20c   : > { %v766_v61 = vmax.f32 %v760_v56, 0.0  ;;  %v751_v62 = vmul.f32 %v749_v47, %v741_v59 }
 0x20d   : > { %v3225_v63 = vpop.eup %3224  ;;  %v752_v0 = vmul.f32 %v749_v47, %v742_v60 }
 0x20e   : > { %v3227_v4 = vpop.eup %3226  ;;  %3002 = vmatprep.mubr.msk.f32.mxu1 %vm666_vm1, %v766_v61  ;;  %v761_v8 = vadd.f32 %v759_v51, %v751_v62  ;;  %v743_v3 = vmul.f32 %v3225_v63, %v3488_v57 }
 0x20f   : > { %v762_v21 = vadd.f32 %v759_v51, %v752_v0  ;;  %v744_v42 = vmul.f32 %v3227_v4, %v3490_v58 }
 0x210   : > { %v767_v22 = vmax.f32 %v761_v8, 0.0  ;;  %v753_v23 = vmul.f32 %v749_v47, %v743_v3 }
 0x211   : > { %v3229_v24 = vpop.eup %3228  ;;  %v768_v25 = vmax.f32 %v762_v21, 0.0  ;;  %v754_v49 = vmul.f32 %v749_v47, %v744_v42 }
 0x212   : > { %3003 = vmatmul.mubr.msk.f32.vlgmr.msra.gmra.mxu1 %vm666_vm1, %v767_v22  ;;  %v763_v48 = vadd.f32 %v759_v51, %v753_v23  ;;  %v745_v26 = vmul.f32 %v3229_v24, %v3498_v2 }
 0x213   : > { %3005 = vmatprep.mubr.msk.f32.mxu1 %vm666_vm1, %v768_v25  ;;  %v764_v27 = vadd.f32 %v759_v51, %v754_v49 }
 0x214   : > { %v769_v28 = vmax.f32 %v763_v48, 0.0  ;;  %v755_v29 = vmul.f32 %v749_v47, %v745_v26 }
 0x215   : > { %v770_v30 = vmax.f32 %v764_v27, 0.0 }
 0x216   : > { %3006 = vmatmul.mubr.msk.f32.gmra.mxu1 %vm666_vm1, %v769_v28  ;;  %v765_v57 = vadd.f32 %v759_v51, %v755_v29 }
 0x217   : > { %3008 = vmatprep.mubr.msk.f32.mxu1 %vm666_vm1, %v770_v30 }
 0x218   : > { %v771_v58 = vmax.f32 %v765_v57, 0.0 }
 0x21a   : > { %3009 = vmatmul.mubr.msk.f32.gmra.mxu1 %vm666_vm1, %v771_v58 }
 0x2d2   : > { %v3004_v32 = vpop.f32.mrf.mxu1 }
 0x2d3   : > { %v870_v2 = vadd.f32 %v3004_v32, %v779_v31 }
 0x2d4   : > { %v864_v33 = vpop.f32.mrf.mxu1 }
 0x2d5   : > { %v865_v34 = vadd.f32 %v864_v33, %v779_v31  ;;  %v896_v35 = vsel %vm666_vm1, %v870_v2, 0.0  ;;  %v1094_v33 = vld [vmem:[%s516_s12 + $0x10] sm:$0xff] }
 0x2d6   : > { %897 = vadd.xlane.f32.xlu1 %v896_v35  ;;  %v3007_v36 = vpop.f32.mrf.mxu1  ;;  %v1092_v35 = vld [vmem:[%s516_s12] sm:$0xff] }
 0x2d7   : > { %v880_v37 = vadd.f32 %v3007_v36, %v779_v31  ;;  %v893_v38 = vsel %vm666_vm1, %v865_v34, 0.0 }
 0x2d8   : > { %894 = vadd.xlane.f32.xlu0 %v893_v38  ;;  %v874_v39 = vpop.f32.mrf.mxu1 }
 0x2d9   : > { %v875_v40 = vadd.f32 %v874_v39, %v779_v31  ;;  %v902_v41 = vsel %vm666_vm1, %v880_v37, 0.0 }
 0x2da   : > { %903 = vadd.xlane.f32.xlu1 %v902_v41  ;;  %v3010_v43 = vpop.f32.mrf.mxu1 }
 0x2db   : > { %v890_v45 = vadd.f32 %v3010_v43, %v779_v31  ;;  %v899_v5 = vsel %vm666_vm1, %v875_v40, 0.0 }
 0x2dc   : > { %900 = vadd.xlane.f32.xlu0 %v899_v5  ;;  %v884_v46 = vpop.f32.mrf.mxu1 }
 0x2dd   : > { %v885_v47 = vadd.f32 %v884_v46, %v779_v31  ;;  %v908_v50 = vsel %vm666_vm1, %v890_v45, 0.0 }
 0x2de   : > { %909 = vadd.xlane.f32.xlu1 %v908_v50 }
 0x2df   : > { %v905_v51 = vsel %vm666_vm1, %v885_v47, 0.0 }
 0x2e0   : > { %906 = vadd.xlane.f32.xlu0 %v905_v51 }
 0x35f   : > { %v898_v53 = vpop.xlane.xlu1 %897 }
 0x360   : > { %v912_v54 = vmul.f32 0.03125, %v898_v53 }
 0x361   : > { %v895_v55 = vpop.xlane.xlu0 %894 }
 0x362   : > { %v3541_v56 = vsub.f32 %v870_v2, %v912_v54  ;;  %v911_v59 = vmul.f32 0.03125, %v895_v55  ;;  %v1095_v2 = vld [vmem:[%s516_s12 + $0x18] sm:$0xff] }
 0x363   : > { %v904_v60 = vpop.xlane.xlu1 %903  ;;  %3011 = vmatprep.subr.mxu1 %v1095_v2 }
 0x364   : > { %v3543_v61 = vsub.f32 %v865_v34, %v911_v59  ;;  %v914_v62 = vmul.f32 0.03125, %v904_v60  ;;  %v924_v63 = vmul.f32 %v3541_v56, %v3541_v56  ;;  %3012 = vmatpush3.msra.mxu1 %v1095_v2  ;;  %v1093_v34 = vld [vmem:[%s516_s12 + $0x8] sm:$0xff]  ;;  %s3837_s12 = scalar_lea.vmem %s4057_s7, %s3506_s26 }
 0x365   : > { %v901_v0 = vpop.xlane.xlu0 %900  ;;  %3013 = vmatprep.subr.mxu1 %v1094_v33 }
 0x366   : > { %v3547_v4 = vsub.f32 %v880_v37, %v914_v62  ;;  %v913_v8 = vmul.f32 0.03125, %v901_v0  ;;  %v932_v3 = vsel %vm666_vm1, %v924_v63, 0.0  ;;  %v923_v21 = vmul.f32 %v3543_v61, %v3543_v61  ;;  %3014 = vmatpush3.msra.mxu1 %v1094_v33 }
 0x367   : > { %933 = vadd.xlane.f32.xlu1 %v932_v3  ;;  %v910_v42 = vpop.xlane.xlu1 %909  ;;  %3015 = vmatprep.subr.mxu1 %v1093_v34  ;;  %v974_v62 = vrot.slane %v3465_v20, %v973_v6 }
 0x368   : > { %v3552_v22 = vsub.f32 %v875_v40, %v913_v8  ;;  %v916_v23 = vmul.f32 0.03125, %v910_v42  ;;  %v929_v24 = vsel %vm666_vm1, %v923_v21, 0.0  ;;  %v926_v25 = vmul.f32 %v3547_v4, %v3547_v4  ;;  %3016 = vmatpush3.msra.mxu1 %v1093_v34 }
 0x369   : > { %930 = vadd.xlane.f32.xlu0 %v929_v24  ;;  %v907_v49 = vpop.xlane.xlu0 %906  ;;  %3017 = vmatprep.subr.mxu1 %v1092_v35  ;;  %v984_v8 = vrot.slane %v3465_v20, %v983_v7 }
 0x36a   : > { %v3557_v48 = vsub.f32 %v890_v45, %v916_v23  ;;  %v915_v26 = vmul.f32 0.03125, %v907_v49  ;;  %v938_v27 = vsel %vm666_vm1, %v926_v25, 0.0  ;;  %v925_v28 = vmul.f32 %v3552_v22, %v3552_v22  ;;  %3018 = vmatpush3.msra.mxu1 %v1092_v35 }
 0x36b   : > { %939 = vadd.xlane.f32.xlu1 %v938_v27 }
 0x36c   : > { %v3562_v29 = vsub.f32 %v885_v47, %v915_v26  ;;  %v935_v30 = vsel %vm666_vm1, %v925_v28, 0.0  ;;  %v928_v57 = vmul.f32 %v3557_v48, %v3557_v48 }
 0x36d   : > { %936 = vadd.xlane.f32.xlu0 %v935_v30 }
 0x36e   : > { %v944_v58 = vsel %vm666_vm1, %v928_v57, 0.0  ;;  %v927_v31 = vmul.f32 %v3562_v29, %v3562_v29 }
 0x36f   : > { %945 = vadd.xlane.f32.xlu1 %v944_v58 }
 0x370   : > { %v941_v32 = vsel %vm666_vm1, %v927_v31, 0.0 }
 0x371   : > { %942 = vadd.xlane.f32.xlu0 %v941_v32 }
 0x380   : > { %1002 = vperm.xlu1 %3215, %v3439_v14  }
 0x384   : > { %1006 = vperm.xlu1 %3215, %v3441_v15  }
 0x387   : > { %998 = vperm.xlu0 %3214, %v3437_v13  }
 0x388   : > { %1010 = vperm.xlu1 %3215, %v3449_v16  }
 0x38c   : > { %1014 = vperm.xlu1 %3215, %v3451_v17  }
 0x390   : > { %1018 = vperm.xlu1 %3215, %v3457_v18  }
 0x3f0   : > { %v934_v36 = vpop.xlane.xlu1 %933 }
 0x3f1   : > { %v948_v37 = vmul.f32 0.03125, %v934_v36  ;;  %v1027_v36 = vld [vmem:[%s3595_s17] sm:$0xff] }
 0x3f2   : > { %v931_v38 = vpop.xlane.xlu0 %930 }
 0x3f3   : > { %v954_v39 = vadd.f32 1e-05, %v948_v37  ;;  %v947_v40 = vmul.f32 0.03125, %v931_v38  ;;  %v1028_v37 = vld [vmem:[%s3595_s17 + $0x8] sm:$0xff] }
 0x3f4   : > { %v940_v41 = vpop.xlane.xlu1 %939 }
 0x3f5   : > { %3230 = vrsqrt.f32 %v954_v39  ;;  %v953_v43 = vadd.f32 1e-05, %v947_v40  ;;  %v950_v45 = vmul.f32 0.03125, %v940_v41 }
 0x3f6   : > { %v937_v5 = vpop.xlane.xlu0 %936 }
 0x3f7   : > { %3232 = vrsqrt.f32 %v953_v43  ;;  %v956_v46 = vadd.f32 1e-05, %v950_v45  ;;  %v949_v47 = vmul.f32 0.03125, %v937_v5  ;;  %v1029_v45 = vld [vmem:[%s3595_s17 + $0x10] sm:$0xff] }
 0x3f8   : > { %v946_v50 = vpop.xlane.xlu1 %945 }
 0x3f9   : > { %3234 = vrsqrt.f32 %v956_v46  ;;  %v955_v51 = vadd.f32 1e-05, %v949_v47  ;;  %v952_v52 = vmul.f32 0.03125, %v946_v50 }
 0x3fa   : > { %v943_v53 = vpop.xlane.xlu0 %942 }
 0x3fb   : > { %3236 = vrsqrt.f32 %v955_v51  ;;  %v958_v54 = vadd.f32 1e-05, %v952_v52  ;;  %v951_v55 = vmul.f32 0.03125, %v943_v53  ;;  %v1030_v52 = vld [vmem:[%s3595_s17 + $0x18] sm:$0xff] }
 0x3fc   : > { %v1003_v59 = vpop.permute.xlu1 %1002 }
 0x3fd   : > { %3238 = vrsqrt.f32 %v958_v54  ;;  %v957_v60 = vadd.f32 1e-05, %v951_v55  ;;  %v1031_v55 = vld [vmem:[%s3595_s17 + $0x20] sm:$0xff] }
 0x3ff   : > { %3240 = vrsqrt.f32 %v957_v60 }
 0x400   : > { %v1007_v0 = vpop.permute.xlu1 %1006 }
 0x402   : > { %v3231_v63 = vpop.eup %3230  ;;  %v999_v31 = vpop.permute.xlu0 %998 }
 0x403   : > { %v966_v3 = vmul.f32 %v3231_v63, %v3541_v56 }
 0x404   : > { %v3233_v21 = vpop.eup %3232  ;;  %v1011_v6 = vpop.permute.xlu1 %1010 }
 0x405   : > { %v976_v42 = vmul.f32 %v974_v62, %v966_v3  ;;  %v965_v23 = vmul.f32 %v3233_v21, %v3543_v61  ;;  %v3325_v21 = vmov 17  }
 0x406   : > { %v3235_v24 = vpop.eup %3234  ;;  %3216 = vset.pattern.permute.xlu0 %v3325_v21  ;;  %3217 = vset.pattern.permute.xlu1 %v3325_v21 }
 0x407   : > { %v986_v25 = vadd.f32 %v984_v8, %v976_v42  ;;  %v968_v49 = vmul.f32 %v3235_v24, %v3547_v4  ;;  %v975_v26 = vmul.f32 %v974_v62, %v965_v23  ;;  %v1102_v42 = vsub.s32 6, %v3399_v1 }
 0x408   : > { %v3237_v27 = vpop.eup %3236  ;;  %v1015_v38 = vpop.permute.xlu1 %1014 }
 0x409   : > { %v992_v28 = vmax.f32 %v986_v25, 0.0  ;;  %v967_v30 = vmul.f32 %v3237_v27, %v3552_v22  ;;  %v978_v57 = vmul.f32 %v974_v62, %v968_v49  ;;  %v985_v58 = vadd.f32 %v984_v8, %v975_v26 }
 0x40a   : > { %v3239_v7 = vpop.eup %3238  ;;  %v1103_v24 = vrot.slane %v3465_v20, %v1102_v42 }
 0x40b   : > { %v977_v56 = vmul.f32 %v974_v62, %v967_v30  ;;  %v988_v61 = vadd.f32 %v984_v8, %v978_v57  ;;  %v970_v4 = vmul.f32 %v3239_v7, %v3557_v48  ;;  %v991_v2 = vmax.f32 %v985_v58, 0.0 }
 0x40c   : > { %v3241_v32 = vpop.eup %3240  ;;  %v1022_v33 = vmul.f32 %v1003_v59, %v992_v28  ;;  %v1019_v59 = vpop.permute.xlu1 %1018 }
 0x40d   : > { %v987_v22 = vadd.f32 %v984_v8, %v977_v56  ;;  %v994_v34 = vmax.f32 %v988_v61, 0.0  ;;  %v969_v35 = vmul.f32 %v3241_v32, %v3562_v29  ;;  %v980_v39 = vmul.f32 %v974_v62, %v970_v4 }
 0x40e   : > { %v1021_v40 = vmul.f32 %v999_v31, %v991_v2  ;;  %v3604_v46 = vadd.f32 %v1028_v37, %v1022_v33 }
 0x40f   : > { %v993_v41 = vmax.f32 %v987_v22, 0.0  ;;  %v979_v43 = vmul.f32 %v974_v62, %v969_v35  ;;  %v990_v5 = vadd.f32 %v984_v8, %v980_v39  ;;  %v1024_v50 = vmul.f32 %v1011_v6, %v994_v34 }
 0x410   : > { %v3602_v48 = vadd.f32 %v1027_v36, %v1021_v40 }
 0x411   : > { %v1023_v47 = vmul.f32 %v1007_v0, %v993_v41  ;;  %v989_v51 = vadd.f32 %v984_v8, %v979_v43  ;;  %v996_v29 = vmax.f32 %v990_v5, 0.0  ;;  %v3614_v60 = vadd.f32 %v1030_v52, %v1024_v50  ;;  %v1032_v0 = vld [vmem:[%s3595_s17 + $0x28] sm:$0xff]  ;;  %v543_v5 = vld [vmem:[%s491_s27] sm:$0x3]  ;;  %s526_s17 = scalar_lea.vmem %s4058_s8, %s3506_s26  ;;  %s536_s26 = scalar_lea.vmem %s4060_s10, %s3411_s22 }
 0x412   : > { %3019 = vmatprep.mubr.msk.f32.mxu1 %vm666_vm1, %v3602_v48  ;;  %vm1073_vm2 = vcmp.gt.f32.partialorder %v543_v5, 0.5 }
 0x413   : > { %v3609_v53 = vadd.f32 %v1029_v45, %v1023_v47  ;;  %v995_v54 = vmax.f32 %v989_v51, 0.0  ;;  %3020 = vmatmul.mubr.msk.f32.vlgmr.msra.gmra.mxu1 %vm666_vm1, %v3604_v46  ;;  %v1026_v63 = vmul.f32 %v1019_v59, %v996_v29  ;;  %v3329_v47 = vmov 0  }
 0x414   : > { %v1074_v50 = vsel %vm1073_vm2, 1, %v3329_v47  ;;  %v1066_v51 = vrot.slane %v543_v5, %v3513_v44 }
 0x415   : > { %v1025_v62 = vmul.f32 %v1015_v38, %v995_v54  ;;  %3022 = vmatprep.mubr.msk.f32.mxu1 %vm666_vm1, %v3609_v53  ;;  %v3623_v3 = vadd.f32 %v1032_v0, %v1026_v63  ;;  %v1078_v52 = vrot.slane %v1074_v50, %v3462_v19  ;;  %v3330_v54 = vmov -1e+09  }
 0x417   : > { %v3619_v8 = vadd.f32 %v1031_v55, %v1025_v62  ;;  %3023 = vmatmul.mubr.msk.f32.gmra.mxu1 %vm666_vm1, %v3614_v60  ;;  %vm3717_vm3 = vcmp.eq.s32.totalorder %v1078_v52, 1 }
 0x419   : > { %3025 = vmatprep.mubr.msk.f32.mxu1 %vm666_vm1, %v3619_v8 }
 0x41b   : > { %3026 = vmatmul.mubr.msk.f32.gmra.mxu1 %vm666_vm1, %v3623_v3 }
 0x4d3   : > { %v3021_v23 = vpop.f32.mrf.mxu1 }
 0x4d4   : > { %v3649_v7 = vadd.f32 %v3021_v23, %v1103_v24 }
 0x4d5   : > { %v1188_v25 = vpop.f32.mrf.mxu1 }
 0x4d6   : > { %v3631_v49 = vadd.f32 %v1188_v25, %v1103_v24 }
 0x4d7   : > { %v3024_v26 = vpop.f32.mrf.mxu1 }
 0x4d8   : > { %3040 = vmatprep.mubr.msk.f32.mxu1 %vm552_vm0, %v3631_v49  ;;  %v3645_v58 = vadd.f32 %v3024_v26, %v1103_v24 }
 0x4d9   : > { %v1198_v27 = vpop.f32.mrf.mxu1 }
 0x4da   : > { %v3635_v6 = vadd.f32 %v1198_v27, %v1103_v24 }
 0x4db   : > { %v3027_v28 = vpop.f32.mrf.mxu1 }
 0x4dc   : > { %v3637_v30 = vadd.f32 %v3027_v28, %v1103_v24  ;;  %1227 = vrot.lane.b32.xlu0 %v3635_v6, %s3326_s18 }
 0x4dd   : > { %v1208_v57 = vpop.f32.mrf.mxu1 }
 0x4de   : > { %1233 = vrot.lane.b32.xlu1 %v3637_v30, %s3326_s18  ;;  %v3641_v20 = vadd.f32 %v1208_v57, %v1103_v24 }
 0x4e0   : > { %1223 = vrot.lane.b32.xlu0 %v3631_v49, %s3326_s18 }
 0x4e2   : > { %1231 = vrot.lane.b32.xlu1 %v3641_v20, %s3326_s18 }
 0x4e4   : > { %1040 = vperm.xlu0 %3216, %v3437_v13  }
 0x4e6   : > { %1229 = vrot.lane.b32.xlu1 %v3645_v58, %s3326_s18 }
 0x4e8   : > { %1048 = vperm.xlu0 %3216, %v3441_v15  }
 0x4ea   : > { %1225 = vrot.lane.b32.xlu1 %v3649_v7, %s3326_s18  ;;  %s2856_s18 = sshll.u32 %s4064_s14, 7 }
 0x4eb   : > { %s3951_s23 = scalar_lea.vmem %s4059_s9, %s2856_s18 }
 0x4ec   : > { %1693 = vrot.lane.b32.xlu0 %v3645_v58, %s3327_s19 }
 0x4ee   : > { %1697 = vrot.lane.b32.xlu1 %v3637_v30, %s3327_s19 }
 0x4f0   : > { %1060 = vperm.xlu0 %3216, %v3457_v18  }
 0x4f2   : > { %1044 = vperm.xlu1 %3217, %v3439_v14  }
 0x4f4   : > { %1689 = vrot.lane.b32.xlu0 %v3649_v7, %s3327_s19 }
 0x4f6   : > { %1052 = vperm.xlu1 %3217, %v3449_v16  }
 0x4f8   : > { %1675 = vrot.lane.b32.xlu0 %v3631_v49, %s3328_s20 }
 0x4fa   : > { %1695 = vrot.lane.b32.xlu1 %v3641_v20, %s3327_s19 }
 0x4fc   : > { %1679 = vrot.lane.b32.xlu0 %v3635_v6, %s3328_s20 }
 0x4fe   : > { %1056 = vperm.xlu1 %3217, %v3451_v17  }
 0x500   : > { %1683 = vrot.lane.b32.xlu0 %v3641_v20, %s3328_s20 }
 0x502   : > { %1691 = vrot.lane.b32.xlu1 %v3635_v6, %s3327_s19 }
 0x506   : > { %1687 = vrot.lane.b32.xlu1 %v3631_v49, %s3327_s19 }
 0x50a   : > { %1677 = vrot.lane.b32.xlu1 %v3649_v7, %s3328_s20 }
 0x50e   : > { %1681 = vrot.lane.b32.xlu1 %v3645_v58, %s3328_s20 }
 0x512   : > { %1685 = vrot.lane.b32.xlu1 %v3637_v30, %s3328_s20 }
 0x54e   : > { %v1228_v15 = vpop.permute.xlu0 %1227 }
 0x550   : > { %v1234_v13 = vpop.permute.xlu1 %1233 }
 0x551   : > { %3028 = vmatprep.subr.msk.mxu1 %vm552_vm0, %v1234_v13 }
 0x552   : > { %3029 = vmatpush3.xpose.msk.msra.mxu1 %vm552_vm0, %v1234_v13  ;;  %v1224_v17 = vpop.permute.xlu0 %1223 }
 0x554   : > { %v1232_v14 = vpop.permute.xlu1 %1231 }
 0x555   : > { %3030 = vmatprep.subr.msk.mxu1 %vm552_vm0, %v1232_v14 }
 0x556   : > { %3031 = vmatpush3.xpose.msk.msra.mxu1 %vm552_vm0, %v1232_v14 }
 0x558   : > { %v1230_v16 = vpop.permute.xlu1 %1229 }
 0x559   : > { %3032 = vmatprep.subr.msk.mxu1 %vm552_vm0, %v1230_v16 }
 0x55a   : > { %3033 = vmatpush3.xpose.msk.msra.mxu1 %vm552_vm0, %v1230_v16 }
 0x55b   : > { %3034 = vmatprep.subr.msk.mxu1 %vm552_vm0, %v1228_v15 }
 0x55c   : > { %v1226_v18 = vpop.permute.xlu1 %1225 }
 0x55e   : > { %3035 = vmatpush3.xpose.msk.msra.mxu1 %vm552_vm0, %v1228_v15 }
 0x55f   : > { %3036 = vmatprep.subr.msk.mxu1 %vm552_vm0, %v1226_v18  ;;  %v1041_v56 = vpop.permute.xlu0 %1040 }
 0x560   : > { %v1698_v4 = vpop.permute.xlu1 %1697  ;;  %vm1067_vm5 = vcmp.eq.f32.partialorder %v1041_v56, %v1066_v51 }
 0x561   : > { %vm1080_vm7 = vmand %vm1067_vm5, %vm3717_vm3 }
 0x562   : > { %3037 = vmatpush3.xpose.msk.msra.mxu1 %vm552_vm0, %v1226_v18  ;;  %v3727_v62 = vsel %vm1080_vm7, 0.0, %v3330_v54 }
 0x563   : > { %3038 = vmatprep.subr.msk.mxu1 %vm552_vm0, %v1224_v17  ;;  %v1049_v61 = vpop.permute.xlu0 %1048 }
 0x564   : > { %vm1069_vm8 = vcmp.eq.f32.partialorder %v1049_v61, %v1066_v51 }
 0x565   : > { %vm1082_vm11 = vmand %vm1069_vm8, %vm3717_vm3 }
 0x566   : > { %3039 = vmatpush3.xpose.msk.msra.mxu1 %vm552_vm0, %v1224_v17  ;;  %v3740_v26 = vsel %vm1082_vm11, 0.0, %v3330_v54 }
 0x567   : > { %3083 = vmatprep.subr.msk.mxu1 %vm552_vm0, %v1698_v4  ;;  %v1694_v31 = vpop.permute.xlu0 %1693 }
 0x569   : > { %3041 = vmatmul.mubr.msk.f32.vlgmr.msra.gmra.mxu1 %vm552_vm0, %v3649_v7 }
 0x56a   : > { %3043 = vmatprep.mubr.msk.f32.mxu1 %vm552_vm0, %v3635_v6  ;;  %3084 = vmatpush3.xpose.msk.msra.mxu1 %vm552_vm0, %v1698_v4 }
 0x56b   : > { %v3687_v32 = vpop.permute.xlu0 %1060 }
 0x56c   : > { %vm1072_vm14 = vcmp.eq.f32.partialorder %v3687_v32, %v1066_v51 }
 0x56d   : > { %v1045_v2 = vpop.permute.xlu1 %1044  ;;  %3044 = vmatmul.mubr.msk.f32.gmra.mxu1 %vm552_vm0, %v3645_v58  ;;  %vm1085_vm2 = vmand %vm1072_vm14, %vm3717_vm3 }
 0x56e   : > { %3046 = vmatprep.mubr.msk.f32.mxu1 %vm552_vm0, %v3641_v20  ;;  %vm1068_vm4 = vcmp.eq.f32.partialorder %v1045_v2, %v1066_v51  ;;  %v3752_v18 = vsel %vm1085_vm2, 0.0, %v3330_v54 }
 0x56f   : > { %v1690_v33 = vpop.permute.xlu0 %1689  ;;  %vm1081_vm6 = vmand %vm1068_vm4, %vm3717_vm3 }
 0x570   : > { %v3725_v55 = vsel %vm1081_vm6, 0.0, %v3330_v54 }
 0x571   : > { %v1053_v22 = vpop.permute.xlu1 %1052  ;;  %3047 = vmatmul.mubr.msk.f32.gmra.mxu1 %vm552_vm0, %v3637_v30 }
 0x572   : > { %vm1070_vm9 = vcmp.eq.f32.partialorder %v1053_v22, %v1066_v51 }
 0x573   : > { %v1676_v34 = vpop.permute.xlu0 %1675  ;;  %vm1083_vm12 = vmand %vm1070_vm9, %vm3717_vm3 }
 0x574   : > { %3095 = vmatprep.mubr.msk.f32.mxu1 %vm552_vm0, %v1676_v34  ;;  %v3738_v25 = vsel %vm1083_vm12, 0.0, %v3330_v54 }
 0x575   : > { %v1696_v35 = vpop.permute.xlu1 %1695 }
 0x576   : > { %3085 = vmatprep.subr.msk.mxu1 %vm552_vm0, %v1696_v35 }
 0x577   : > { %3086 = vmatpush3.xpose.msk.msra.mxu1 %vm552_vm0, %v1696_v35  ;;  %v1680_v40 = vpop.permute.xlu0 %1679 }
 0x578   : > { %3087 = vmatprep.subr.msk.mxu1 %vm552_vm0, %v1694_v31 }
 0x579   : > { %v1057_v36 = vpop.permute.xlu1 %1056 }
 0x57a   : > { %vm1071_vm13 = vcmp.eq.f32.partialorder %v1057_v36, %v1066_v51 }
 0x57b   : > { %3088 = vmatpush3.xpose.msk.msra.mxu1 %vm552_vm0, %v1694_v31  ;;  %v1684_v43 = vpop.permute.xlu0 %1683  ;;  %vm1084_vm15 = vmand %vm1071_vm13, %vm3717_vm3 }
 0x57c   : > { %v3749_v15 = vsel %vm1084_vm15, 0.0, %v3330_v54 }
 0x57d   : > { %v1692_v37 = vpop.permute.xlu1 %1691 }
 0x57e   : > { %3089 = vmatprep.subr.msk.mxu1 %vm552_vm0, %v1692_v37 }
 0x57f   : > { %3090 = vmatpush3.xpose.msk.msra.mxu1 %vm552_vm0, %v1692_v37 }
 0x580   : > { %3091 = vmatprep.subr.msk.mxu1 %vm552_vm0, %v1690_v33 }
 0x581   : > { %v1688_v38 = vpop.permute.xlu1 %1687 }
 0x583   : > { %3092 = vmatpush3.xpose.msk.msra.mxu1 %vm552_vm0, %v1690_v33 }
 0x584   : > { %3093 = vmatprep.subr.msk.mxu1 %vm552_vm0, %v1688_v38 }
 0x585   : > { %v1678_v39 = vpop.permute.xlu1 %1677 }
 0x587   : > { %3094 = vmatpush3.xpose.msk.msra.mxu1 %vm552_vm0, %v1688_v38 }
 0x589   : > { %v1682_v41 = vpop.permute.xlu1 %1681 }
 0x58a   : > { %3096 = vmatmul.mubr.msk.f32.vlgmr.msra.gmra.mxu1 %vm552_vm0, %v1678_v39 }
 0x58b   : > { %3098 = vmatprep.mubr.msk.f32.mxu1 %vm552_vm0, %v1680_v40 }
 0x58d   : > { %v1686_v45 = vpop.permute.xlu1 %1685 }
 0x58e   : > { %3099 = vmatmul.mubr.msk.f32.gmra.mxu1 %vm552_vm0, %v1682_v41 }
 0x58f   : > { %3101 = vmatprep.mubr.msk.f32.mxu1 %vm552_vm0, %v1684_v43 }
 0x592   : > { %3102 = vmatmul.mubr.msk.f32.gmra.mxu1 %vm552_vm0, %v1686_v45 }
 0x629   : > { %v3042_v59 = vpop.f32.mrf.mxu1 }
 0x62a   : > { %v1331_v63 = vadd.f32 %v3042_v59, %v3725_v55 }
 0x62b   : > { %v1325_v0 = vpop.f32.mrf.mxu1 }
 0x62c   : > { %v1326_v21 = vadd.f32 %v1325_v0, %v3727_v62  ;;  %v1358_v42 = vsel %vm1354_vm10, %v1331_v63, -inf }
 0x62d   : > { %1359 = vmax.xlane.f32.xlu1 %v1358_v42  ;;  %v3045_v23 = vpop.f32.mrf.mxu1 }
 0x62e   : > { %v1355_v24 = vsel %vm1354_vm10, %v1326_v21, -inf  ;;  %v1341_v13 = vadd.f32 %v3045_v23, %v3738_v25 }
 0x62f   : > { %v1335_v27 = vpop.f32.mrf.mxu1  ;;  %1356 = vmax.xlane.f32.xlu0 %v1355_v24 }
 0x630   : > { %v1336_v28 = vadd.f32 %v1335_v27, %v3740_v26  ;;  %v1364_v4 = vsel %vm1354_vm10, %v1341_v13, -inf }
 0x631   : > { %v3048_v57 = vpop.f32.mrf.mxu1 }
 0x632   : > { %v1361_v14 = vsel %vm1354_vm10, %v1336_v28, -inf  ;;  %v1351_v56 = vadd.f32 %v3048_v57, %v3752_v18 }
 0x633   : > { %v1345_v16 = vpop.f32.mrf.mxu1  ;;  %1362 = vmax.xlane.f32.xlu0 %v1361_v14 }
 0x634   : > { %v1346_v17 = vadd.f32 %v1345_v16, %v3749_v15  ;;  %v1370_v31 = vsel %vm1354_vm10, %v1351_v56, -inf }
 0x636   : > { %v1367_v61 = vsel %vm1354_vm10, %v1346_v17, -inf }
 0x637   : > { %1368 = vmax.xlane.f32.xlu1 %v1367_v61  ;;  %1365 = vmax.xlane.f32.xlu0 %v1364_v4 }
 0x63b   : > { %1371 = vmax.xlane.f32.xlu0 %v1370_v31 }
 0x648   : > { %1431 = vrot.lane.b32.xlu1 %v3637_v30, %s3331_s28 }
 0x64c   : > { %1427 = vrot.lane.b32.xlu1 %v3645_v58, %s3331_s28 }
 0x650   : > { %1425 = vrot.lane.b32.xlu1 %v3635_v6, %s3331_s28 }
 0x651   : > { %1429 = vrot.lane.b32.xlu0 %v3641_v20, %s3331_s28 }
 0x6b6   : > { %v1360_v32 = vpop.xlane.xlu1 %1359 }
 0x6b7   : > { %v1374_v2 = vsub.f32 %v1331_v63, %v1360_v32 }
 0x6b8   : > { %v1357_v33 = vpop.xlane.xlu0 %1356 }
 0x6b9   : > { %v1381_v22 = vmul.f32 1.442695, %v1374_v2  ;;  %v1373_v34 = vsub.f32 %v1326_v21, %v1357_v33 }
 0x6bb   : > { %3242 = vpow2.f32 %v1381_v22  ;;  %v1379_v35 = vmul.f32 1.442695, %v1373_v34 }
 0x6bc   : > { %v1363_v36 = vpop.xlane.xlu0 %1362 }
 0x6bd   : > { %3244 = vpow2.f32 %v1379_v35  ;;  %v1375_v37 = vsub.f32 %v1336_v28, %v1363_v36 }
 0x6bf   : > { %v1383_v38 = vmul.f32 1.442695, %v1375_v37 }
 0x6c0   : > { %v1369_v39 = vpop.xlane.xlu1 %1368  ;;  %v1366_v40 = vpop.xlane.xlu0 %1365 }
 0x6c1   : > { %3246 = vpow2.f32 %v1383_v38  ;;  %v1377_v41 = vsub.f32 %v1346_v17, %v1369_v39  ;;  %v1376_v43 = vsub.f32 %v1341_v13, %v1366_v40  ;;  %v3097_v17 = vpop.f32.mrf.mxu1 }
 0x6c2   : > { %v3795_v32 = vadd.f32 %v3097_v17, %v3725_v55 }
 0x6c3   : > { %v1387_v45 = vmul.f32 1.442695, %v1377_v41  ;;  %v1385_v5 = vmul.f32 1.442695, %v1376_v43 }
 0x6c4   : > { %v1432_v47 = vpop.permute.xlu1 %1431  ;;  %v1372_v50 = vpop.xlane.xlu0 %1371  ;;  %v1821_v22 = vsel %vm1354_vm10, %v3795_v32, -inf }
 0x6c5   : > { %3248 = vpow2.f32 %v1387_v45  ;;  %v1378_v51 = vsub.f32 %v1351_v56, %v1372_v50  ;;  %3049 = vmatprep.subr.mxu0 %v1432_v47  ;;  %v1789_v56 = vpop.f32.mrf.mxu1  ;;  %v1097_v50 = vld [vmem:[%s3837_s12 + $0x8] sm:$0xff] }
 0x6c6   : > { %3250 = vpow2.f32 %v1385_v5  ;;  %3050 = vmatpush3.msra.mxu0 %v1432_v47  ;;  %v3803_v34 = vadd.f32 %v1789_v56, %v3727_v62 }
 0x6c7   : > { %v1389_v52 = vmul.f32 1.442695, %v1378_v51  ;;  %v3100_v61 = vpop.f32.mrf.mxu1 }
 0x6c8   : > { %v3766_v29 = vpop.eup %3242  ;;  %v1428_v54 = vpop.permute.xlu1 %1427  ;;  %v1818_v55 = vsel %vm1354_vm10, %v3803_v34, -inf }
 0x6c9   : > { %v1430_v59 = vpop.permute.xlu0 %1429  ;;  %3252 = vpow2.f32 %v1389_v52  ;;  %v1394_v63 = vsel %vm1354_vm10, %v3766_v29, 0.0  ;;  %v1799_v4 = vpop.f32.mrf.mxu1  ;;  %v1096_v52 = vld [vmem:[%s3837_s12] sm:$0xff] }
 0x6ca   : > { %3051 = vmatprep.subr.mxu0 %v1430_v59  ;;  %v3770_v0 = vpop.eup %3244  ;;  %1395 = vadd.xlane.f32.xlu0 %v1394_v63  ;;  %v3808_v36 = vadd.f32 %v1799_v4, %v3740_v26 }
 0x6cb   : > { %3052 = vmatpush3.msra.mxu0 %v1430_v59  ;;  %v1391_v21 = vsel %vm1354_vm10, %v3770_v0, 0.0  ;;  %v3103_v31 = vpop.f32.mrf.mxu1 }
 0x6cc   : > { %3053 = vmatprep.subr.mxu0 %v1428_v54  ;;  %v1426_v42 = vpop.permute.xlu1 %1425  ;;  %1392 = vadd.xlane.f32.xlu1 %v1391_v21  ;;  %v1824_v37 = vsel %vm1354_vm10, %v3808_v36, -inf  ;;  %v3818_v62 = vadd.f32 %v3103_v31, %v3752_v18 }
 0x6cd   : > { %3054 = vmatpush3.msra.mxu0 %v1428_v54  ;;  %v1809_v2 = vpop.f32.mrf.mxu1 }
 0x6ce   : > { %3055 = vmatprep.subr.mxu0 %v1426_v42  ;;  %v3774_v23 = vpop.eup %3246  ;;  %v3798_v33 = vadd.f32 %v1809_v2, %v3749_v15  ;;  %v3813_v15 = vadd.f32 %v3100_v61, %v3738_v25  ;;  %v1833_v26 = vsel %vm1354_vm10, %v3818_v62, -inf }
 0x6cf   : > { %3056 = vmatpush3.msra.mxu0 %v1426_v42  ;;  %v1397_v24 = vsel %vm1354_vm10, %v3774_v23, 0.0 }
 0x6d0   : > { %1398 = vadd.xlane.f32.xlu1 %v1397_v24  ;;  %v1830_v35 = vsel %vm1354_vm10, %v3798_v33, -inf  ;;  %v1827_v38 = vsel %vm1354_vm10, %v3813_v15, -inf }
 0x6d2   : > { %v3778_v27 = vpop.eup %3248 }
 0x6d3   : > { %v3780_v28 = vpop.eup %3250  ;;  %v1403_v57 = vsel %vm1354_vm10, %v3778_v27, 0.0 }
 0x6d4   : > { %1404 = vadd.xlane.f32.xlu1 %v1403_v57  ;;  %v1400_v13 = vsel %vm1354_vm10, %v3780_v28, 0.0 }
 0x6d5   : > { %1401 = vadd.xlane.f32.xlu0 %v1400_v13 }
 0x6d6   : > { %v3786_v14 = vpop.eup %3252 }
 0x6d7   : > { %v1406_v16 = vsel %vm1354_vm10, %v3786_v14, 0.0 }
 0x6d9   : > { %1407 = vadd.xlane.f32.xlu0 %v1406_v16 }
 0x6e5   : > { %1421 = vrot.lane.b32.xlu1 %v3631_v49, %s3331_s28 }
 0x6ef   : > { %1423 = vrot.lane.b32.xlu0 %v3649_v7, %s3331_s28 }
 0x709   : > { %1822 = vmax.xlane.f32.xlu1 %v1821_v22 }
 0x70d   : > { %1831 = vmax.xlane.f32.xlu1 %v1830_v35 }
 0x70e   : > { %1819 = vmax.xlane.f32.xlu0 %v1818_v55 }
 0x712   : > { %1825 = vmax.xlane.f32.xlu0 %v1824_v37 }
 0x716   : > { %1828 = vmax.xlane.f32.xlu0 %v1827_v38 }
 0x71a   : > { %1834 = vmax.xlane.f32.xlu0 %v1833_v26 }
 0x71e   : > { %1894 = vrot.lane.b32.xlu1 %v3637_v30, %s3332_s29 }
 0x722   : > { %1890 = vrot.lane.b32.xlu1 %v3645_v58, %s3332_s29 }
 0x726   : > { %1888 = vrot.lane.b32.xlu1 %v3635_v6, %s3332_s29 }
 0x730   : > { %1892 = vrot.lane.b32.xlu0 %v3641_v20, %s3332_s29 }
 0x753   : > { %v1396_v18 = vpop.xlane.xlu0 %1395 }
 0x755   : > { %v1393_v25 = vpop.xlane.xlu1 %1392 }
 0x756   : > { %3254 = vrcp.f32 %v1393_v25 }
 0x757   : > { %3256 = vrcp.f32 %v1396_v18 }
 0x759   : > { %v1399_v39 = vpop.xlane.xlu1 %1398 }
 0x75a   : > { %3258 = vrcp.f32 %v1399_v39 }
 0x75d   : > { %v1405_v40 = vpop.xlane.xlu1 %1404 }
 0x75e   : > { %3260 = vrcp.f32 %v1405_v40  ;;  %v1402_v41 = vpop.xlane.xlu0 %1401 }
 0x75f   : > { %3262 = vrcp.f32 %v1402_v41 }
 0x761   : > { %v1422_v5 = vpop.permute.xlu1 %1421 }
 0x762   : > { %v1408_v30 = vpop.xlane.xlu0 %1407 }
 0x763   : > { %v3255_v43 = vpop.eup %3254  ;;  %3264 = vrcp.f32 %v1408_v30 }
 0x764   : > { %v1415_v58 = vmul.f32 %v3255_v43, %v3770_v0  ;;  %v3257_v6 = vpop.eup %3256 }
 0x765   : > { %v1416_v51 = vmul.f32 %v3257_v6, %v3766_v29 }
 0x766   : > { %v1424_v20 = vpop.permute.xlu0 %1423  ;;  %3061 = vmatprep.mubr.msk.f32.mxu0 %vm1354_vm10, %v1415_v58 }
 0x767   : > { %v3259_v45 = vpop.eup %3258  ;;  %3057 = vmatprep.subr.mxu0 %v1424_v20 }
 0x768   : > { %3058 = vmatpush3.msra.mxu0 %v1424_v20  ;;  %v1417_v47 = vmul.f32 %v3259_v45, %v3774_v23 }
 0x769   : > { %3059 = vmatprep.subr.mxu0 %v1422_v5 }
 0x76a   : > { %3060 = vmatpush3.msra.mxu0 %v1422_v5 }
 0x76b   : > { %v3261_v54 = vpop.eup %3260  ;;  %3062 = vmatmul.mubr.msk.f32.vlgmr.msra.gmra.mxu0 %vm1354_vm10, %v1416_v51  ;;  %3070 = vmatprep.subr.mxu0 %v1097_v50 }
 0x76c   : > { %v3263_v59 = vpop.eup %3262  ;;  %3064 = vmatprep.mubr.msk.f32.mxu0 %vm1354_vm10, %v1417_v47  ;;  %v1419_v63 = vmul.f32 %v3261_v54, %v3778_v27  ;;  %3071 = vmatpush3.msra.mxu0 %v1097_v50 }
 0x76d   : > { %v1418_v0 = vmul.f32 %v3263_v59, %v3780_v28  ;;  %3072 = vmatprep.subr.mxu0 %v1096_v52 }
 0x76e   : > { %3073 = vmatpush3.msra.mxu0 %v1096_v52 }
 0x76f   : > { %3065 = vmatmul.mubr.msk.f32.gmra.mxu0 %vm1354_vm10, %v1418_v0 }
 0x770   : > { %v3265_v29 = vpop.eup %3264  ;;  %3067 = vmatprep.mubr.msk.f32.mxu0 %vm1354_vm10, %v1419_v63 }
 0x771   : > { %v1420_v21 = vmul.f32 %v3265_v29, %v3786_v14 }
 0x773   : > { %3068 = vmatmul.mubr.msk.f32.gmra.mxu0 %vm1354_vm10, %v1420_v21 }
 0x792   : > { %v1823_v42 = vpop.xlane.xlu1 %1822 }
 0x793   : > { %v1837_v23 = vsub.f32 %v3795_v32, %v1823_v42 }
 0x795   : > { %v1844_v24 = vmul.f32 1.442695, %v1837_v23 }
 0x796   : > { %v1832_v57 = vpop.xlane.xlu1 %1831 }
 0x797   : > { %3266 = vpow2.f32 %v1844_v24  ;;  %v1820_v27 = vpop.xlane.xlu0 %1819  ;;  %v1840_v13 = vsub.f32 %v3798_v33, %v1832_v57 }
 0x798   : > { %v1836_v28 = vsub.f32 %v3803_v34, %v1820_v27 }
 0x799   : > { %v1850_v61 = vmul.f32 1.442695, %v1840_v13 }
 0x79a   : > { %v1842_v16 = vmul.f32 1.442695, %v1836_v28  ;;  %v1895_v17 = vpop.permute.xlu1 %1894 }
 0x79b   : > { %v1826_v56 = vpop.xlane.xlu0 %1825  ;;  %3104 = vmatprep.subr.mxu0 %v1895_v17 }
 0x79c   : > { %3268 = vpow2.f32 %v1842_v16  ;;  %v1838_v14 = vsub.f32 %v3808_v36, %v1826_v56  ;;  %v1099_v56 = vld [vmem:[%s3837_s12 + $0x18] sm:$0xff] }
 0x79e   : > { %v1846_v4 = vmul.f32 1.442695, %v1838_v14  ;;  %v1891_v41 = vpop.permute.xlu1 %1890  ;;  %v1098_v14 = vld [vmem:[%s3837_s12 + $0x10] sm:$0xff] }
 0x79f   : > { %v1829_v31 = vpop.xlane.xlu0 %1828 }
 0x7a0   : > { %3270 = vpow2.f32 %v1846_v4  ;;  %v1839_v32 = vsub.f32 %v3813_v15, %v1829_v31 }
 0x7a1   : > { %3272 = vpow2.f32 %v1850_v61  ;;  %v3891_v61 = vld [vmem:[%s3407_s21 + $0x8] sm:$0x3f] }
 0x7a2   : > { %v1848_v2 = vmul.f32 1.442695, %v1839_v32  ;;  %v1889_v6 = vpop.permute.xlu1 %1888  ;;  %v1668_v4 = vrot.slane %v3891_v61, %v3462_v19 }
 0x7a3   : > { %v1835_v22 = vpop.xlane.xlu0 %1834 }
 0x7a4   : > { %v3857_v35 = vpop.eup %3266  ;;  %3274 = vpow2.f32 %v1848_v2  ;;  %v1841_v33 = vsub.f32 %v3818_v62, %v1835_v22 }
 0x7a5   : > { %v1857_v34 = vsel %vm1354_vm10, %v3857_v35, 0.0 }
 0x7a6   : > { %v1852_v55 = vmul.f32 1.442695, %v1841_v33  ;;  %1858 = vadd.xlane.f32.xlu0 %v1857_v34 }
 0x7a7   : > { %v1893_v20 = vpop.permute.xlu0 %1892 }
 0x7a8   : > { %3276 = vpow2.f32 %v1852_v55 }
 0x7a9   : > { %v3269_v36 = vpop.eup %3268 }
 0x7aa   : > { %v1854_v37 = vsel %vm1354_vm10, %v3269_v36, 0.0 }
 0x7ab   : > { %1855 = vadd.xlane.f32.xlu1 %v1854_v37 }
 0x7ad   : > { %v3271_v38 = vpop.eup %3270 }
 0x7ae   : > { %v1860_v15 = vsel %vm1354_vm10, %v3271_v38, 0.0  ;;  %v3864_v26 = vpop.eup %3272 }
 0x7af   : > { %1861 = vadd.xlane.f32.xlu1 %v1860_v15  ;;  %v1866_v62 = vsel %vm1354_vm10, %v3864_v26, 0.0 }
 0x7b1   : > { %v3275_v25 = vpop.eup %3274 }
 0x7b2   : > { %v1863_v18 = vsel %vm1354_vm10, %v3275_v25, 0.0 }
 0x7b3   : > { %1867 = vadd.xlane.f32.xlu1 %v1866_v62  ;;  %1864 = vadd.xlane.f32.xlu0 %v1863_v18 }
 0x7b5   : > { %v3277_v39 = vpop.eup %3276 }
 0x7b6   : > { %v1869_v40 = vsel %vm1354_vm10, %v3277_v39, 0.0 }
 0x7b7   : > { %1870 = vadd.xlane.f32.xlu0 %v1869_v40 }
 0x7c4   : > { %1884 = vrot.lane.b32.xlu1 %v3631_v49, %s3332_s29 }
 0x7cd   : > { %1886 = vrot.lane.b32.xlu0 %v3649_v7, %s3332_s29 }
 0x82b   : > { %v3063_v30 = vpop.f32.mrf.mxu0 }
 0x82d   : > { %v1523_v43 = vpop.f32.mrf.mxu0 }
 0x82e   : > { %3074 = vmatprep.mubr.msk.f32.mxu0 %vm552_vm0, %v1523_v43 }
 0x82f   : > { %v3066_v58 = vpop.f32.mrf.mxu0  ;;  %3075 = vmatmul.mubr.msk.f32.vlgmr.msra.gmra.mxu0 %vm552_vm0, %v3063_v30  ;;  %v1859_v7 = vpop.xlane.xlu0 %1858 }
 0x830   : > { %3105 = vmatpush3.msra.mxu0 %v1895_v17 }
 0x831   : > { %3106 = vmatprep.subr.mxu0 %v1893_v20  ;;  %v1533_v45 = vpop.f32.mrf.mxu0 }
 0x832   : > { %3107 = vmatpush3.msra.mxu0 %v1893_v20  ;;  %3077 = vmatprep.mubr.msk.f32.mxu0 %vm552_vm0, %v1533_v45 }
 0x833   : > { %3108 = vmatprep.subr.mxu0 %v1891_v41  ;;  %v3069_v49 = vpop.f32.mrf.mxu0  ;;  %3078 = vmatmul.mubr.msk.f32.gmra.mxu0 %vm552_vm0, %v3066_v58 }
 0x834   : > { %3109 = vmatpush3.msra.mxu0 %v1891_v41  ;;  %v1856_v5 = vpop.xlane.xlu1 %1855 }
 0x835   : > { %3278 = vrcp.f32 %v1856_v5  ;;  %3110 = vmatprep.subr.mxu0 %v1889_v6  ;;  %v1543_v47 = vpop.f32.mrf.mxu0 }
 0x836   : > { %3111 = vmatpush3.msra.mxu0 %v1889_v6  ;;  %3080 = vmatprep.mubr.msk.f32.mxu0 %vm552_vm0, %v1543_v47  ;;  %3280 = vrcp.f32 %v1859_v7 }
 0x837   : > { %3081 = vmatmul.mubr.msk.f32.gmra.mxu0 %vm552_vm0, %v3069_v49 }
 0x838   : > { %v1862_v50 = vpop.xlane.xlu1 %1861 }
 0x839   : > { %3282 = vrcp.f32 %v1862_v50 }
 0x83c   : > { %v1868_v51 = vpop.xlane.xlu1 %1867  ;;  %v1865_v52 = vpop.xlane.xlu0 %1864 }
 0x83d   : > { %3284 = vrcp.f32 %v1868_v51 }
 0x83e   : > { %3286 = vrcp.f32 %v1865_v52 }
 0x840   : > { %v1871_v54 = vpop.xlane.xlu0 %1870  ;;  %v1885_v42 = vpop.permute.xlu1 %1884 }
 0x841   : > { %3288 = vrcp.f32 %v1871_v54 }
 0x842   : > { %v3279_v59 = vpop.eup %3278 }
 0x843   : > { %v1878_v63 = vmul.f32 %v3279_v59, %v3269_v36  ;;  %v3281_v0 = vpop.eup %3280 }
 0x844   : > { %v1887_v29 = vpop.permute.xlu0 %1886  ;;  %v1879_v23 = vmul.f32 %v3281_v0, %v3857_v35 }
 0x845   : > { %3112 = vmatprep.subr.mxu0 %v1887_v29  ;;  %3116 = vmatprep.mubr.msk.f32.mxu0 %vm1354_vm10, %v1878_v63 }
 0x846   : > { %v3283_v21 = vpop.eup %3282  ;;  %3113 = vmatpush3.msra.mxu0 %v1887_v29 }
 0x847   : > { %3114 = vmatprep.subr.mxu0 %v1885_v42  ;;  %v1880_v24 = vmul.f32 %v3283_v21, %v3271_v38 }
 0x848   : > { %3115 = vmatpush3.msra.mxu0 %v1885_v42 }
 0x849   : > { %3117 = vmatmul.mubr.msk.f32.vlgmr.msra.gmra.mxu0 %vm1354_vm10, %v1879_v23  ;;  %3125 = vmatprep.subr.mxu0 %v1099_v56 }
 0x84a   : > { %v3285_v57 = vpop.eup %3284  ;;  %3119 = vmatprep.mubr.msk.f32.mxu0 %vm1354_vm10, %v1880_v24  ;;  %3126 = vmatpush3.msra.mxu0 %v1099_v56 }
 0x84b   : > { %v3287_v27 = vpop.eup %3286  ;;  %v1882_v28 = vmul.f32 %v3285_v57, %v3864_v26  ;;  %3127 = vmatprep.subr.mxu0 %v1098_v14 }
 0x84c   : > { %v1881_v13 = vmul.f32 %v3287_v27, %v3275_v25  ;;  %3128 = vmatpush3.msra.mxu0 %v1098_v14 }
 0x84e   : > { %v3289_v16 = vpop.eup %3288  ;;  %3120 = vmatmul.mubr.msk.f32.gmra.mxu0 %vm1354_vm10, %v1881_v13 }
 0x84f   : > { %3122 = vmatprep.mubr.msk.f32.mxu0 %vm1354_vm10, %v1882_v28  ;;  %v1883_v17 = vmul.f32 %v3289_v16, %v3277_v39 }
 0x852   : > { %3123 = vmatmul.mubr.msk.f32.gmra.mxu0 %vm1354_vm10, %v1883_v17 }
 0x8ef   : > { %v3076_v31 = vpop.f32.mrf.mxu0 }
 0x8f0   : > { %v1670_v32 = vadd.f32 %v3076_v31, %v1668_v4 }
 0x8f1   : > { %v1636_v2 = vpop.f32.mrf.mxu0 }
 0x8f2   : > { %v1669_v22 = vadd.f32 %v1668_v4, %v1636_v2 }
 0x8f3   : > { %v3079_v35 = vpop.f32.mrf.mxu0 }
 0x8f4   : > { %v1672_v33 = vadd.f32 %v3079_v35, %v1668_v4 }
 0x8f5   : > { %v1646_v34 = vpop.f32.mrf.mxu0 }
 0x8f6   : > { %v1671_v55 = vadd.f32 %v1668_v4, %v1646_v34 }
 0x8f7   : > { %v3082_v36 = vpop.f32.mrf.mxu0 }
 0x8f8   : > { %v1674_v37 = vadd.f32 %v3082_v36, %v1668_v4 }
 0x8f9   : > { %v1656_v38 = vpop.f32.mrf.mxu0 }
 0x8fa   : > { %v1673_v15 = vadd.f32 %v1668_v4, %v1656_v38 }
 0x909   : > { %v3118_v26 = vpop.f32.mrf.mxu0 }
 0x90b   : > { %v1986_v25 = vpop.f32.mrf.mxu0 }
 0x90c   : > { %3129 = vmatprep.mubr.msk.f32.mxu0 %vm552_vm0, %v1986_v25 }
 0x90d   : > { %3130 = vmatmul.mubr.msk.f32.vlgmr.msra.gmra.mxu0 %vm552_vm0, %v3118_v26 }
 0x90e   : > { %v3121_v62 = vpop.f32.mrf.mxu0 }
 0x910   : > { %v1996_v19 = vpop.f32.mrf.mxu0 }
 0x911   : > { %3132 = vmatprep.mubr.msk.f32.mxu0 %vm552_vm0, %v1996_v19  ;;  %v2241_v19 = vld [vmem:[%s526_s17 + $0x18] sm:$0xff] }
 0x912   : > { %v3124_v18 = vpop.f32.mrf.mxu0  ;;  %3133 = vmatmul.mubr.msk.f32.gmra.mxu0 %vm552_vm0, %v3121_v62  ;;  %3138 = vmatprep.subr.mxu1 %v2241_v19 }
 0x913   : > { %3139 = vmatpush3.msra.mxu1 %v2241_v19 }
 0x914   : > { %v2006_v39 = vpop.f32.mrf.mxu0 }
 0x915   : > { %3135 = vmatprep.mubr.msk.f32.mxu0 %vm552_vm0, %v2006_v39  ;;  %v2239_v39 = vld [vmem:[%s526_s17 + $0x8] sm:$0xff] }
 0x916   : > { %3136 = vmatmul.mubr.msk.f32.gmra.mxu0 %vm552_vm0, %v3124_v18  ;;  %v2240_v18 = vld [vmem:[%s526_s17 + $0x10] sm:$0xff] }
 0x917   : > { %3140 = vmatprep.subr.mxu1 %v2240_v18 }
 0x918   : > { %3141 = vmatpush3.msra.mxu1 %v2240_v18  ;;  %v2368_v18 = vld [vmem:[%s3951_s23 + $0x18] sm:$0xff] }
 0x919   : > { %3142 = vmatprep.subr.mxu1 %v2239_v39 }
 0x91a   : > { %3143 = vmatpush3.msra.mxu1 %v2239_v39  ;;  %v2367_v39 = vld [vmem:[%s3951_s23 + $0x10] sm:$0xff] }
 0x9cd   : > { %v3131_v40 = vpop.f32.mrf.mxu0 }
 0x9ce   : > { %v2129_v41 = vadd.f32 %v3131_v40, %v1670_v32  ;;  %v2238_v40 = vld [vmem:[%s526_s17] sm:$0xff] }
 0x9cf   : > { %v2099_v30 = vpop.f32.mrf.mxu0  ;;  %3144 = vmatprep.subr.mxu1 %v2238_v40 }
 0x9d0   : > { %v2135_v43 = vadd.f32 %v2129_v41, %v3604_v46  ;;  %v2128_v58 = vadd.f32 %v2099_v30, %v1669_v22  ;;  %3145 = vmatpush3.msra.mxu1 %v2238_v40  ;;  %v2380_v41 = vld [vmem:[%s3951_s23 + $0x78] sm:$0xff]  ;;  %v2379_v30 = vld [vmem:[%s3951_s23 + $0x70] sm:$0xff]  ;;  %v2365_v40 = vld [vmem:[%s3951_s23] sm:$0xff] }
 0x9d1   : > { %3155 = vmatprep.subr.mxu0 %v2380_v41 }
 0x9d2   : > { %v3134_v6 = vpop.f32.mrf.mxu0  ;;  %v2143_v20 = vsel %vm666_vm1, %v2135_v43, 0.0  ;;  %v2134_v45 = vadd.f32 %v2128_v58, %v3602_v48  ;;  %3156 = vmatpush3.msra.mxu0 %v2380_v41  ;;  %v2377_v58 = vld [vmem:[%s3951_s23 + $0x60] sm:$0xff]  ;;  %v2244_v41 = vsub.s32 7, %v3399_v1 }
 0x9d3   : > { %2144 = vadd.xlane.f32.xlu1 %v2143_v20  ;;  %v2131_v5 = vadd.f32 %v3134_v6, %v1672_v33  ;;  %3157 = vmatprep.subr.mxu0 %v2379_v30  ;;  %v2376_v6 = vld [vmem:[%s3951_s23 + $0x58] sm:$0xff]  ;;  %v2375_v20 = vld [vmem:[%s3951_s23 + $0x50] sm:$0xff] }
 0x9d4   : > { %v2109_v49 = vpop.f32.mrf.mxu0  ;;  %v2140_v7 = vsel %vm666_vm1, %v2134_v45, 0.0  ;;  %3158 = vmatpush3.msra.mxu0 %v2379_v30  ;;  %v3315_v30 = vld [vmem:[%s3407_s21] sm:$0xff] }
 0x9d5   : > { %v2130_v47 = vadd.f32 %v2109_v49, %v1671_v55  ;;  %2141 = vadd.xlane.f32.xlu0 %v2140_v7  ;;  %v2137_v63 = vadd.f32 %v2131_v5, %v3614_v60  ;;  %v2373_v49 = vld [vmem:[%s3951_s23 + $0x40] sm:$0xff]  ;;  %v2372_v7 = vld [vmem:[%s3951_s23 + $0x38] sm:$0xff]  ;;  %v2371_v5 = vld [vmem:[%s3951_s23 + $0x30] sm:$0xff] }
 0x9d6   : > { %v3137_v50 = vpop.f32.mrf.mxu0 }
 0x9d7   : > { %v2136_v51 = vadd.f32 %v2130_v47, %v3609_v53  ;;  %v2133_v54 = vadd.f32 %v3137_v50, %v1674_v37  ;;  %v2149_v0 = vsel %vm666_vm1, %v2137_v63, 0.0  ;;  %v2370_v47 = vld [vmem:[%s3951_s23 + $0x28] sm:$0xff]  ;;  %v2369_v50 = vld [vmem:[%s3951_s23 + $0x20] sm:$0xff] }
 0x9d8   : > { %v2119_v52 = vpop.f32.mrf.mxu0 }
 0x9d9   : > { %v2132_v59 = vadd.f32 %v2119_v52, %v1673_v15  ;;  %v2146_v46 = vsel %vm666_vm1, %v2136_v51, 0.0  ;;  %v2139_v21 = vadd.f32 %v2133_v54, %v3623_v3 }
 0x9da   : > { %2147 = vadd.xlane.f32.xlu0 %v2146_v46 }
 0x9db   : > { %v2138_v48 = vadd.f32 %v2132_v59, %v3619_v8  ;;  %v2155_v53 = vsel %vm666_vm1, %v2139_v21, 0.0 }
 0x9dd   : > { %v2152_v29 = vsel %vm666_vm1, %v2138_v48, 0.0 }
 0x9de   : > { %2150 = vadd.xlane.f32.xlu0 %v2149_v0  ;;  %2153 = vadd.xlane.f32.xlu1 %v2152_v29 }
 0x9e2   : > { %2156 = vadd.xlane.f32.xlu0 %v2155_v53 }
 0xa5c   : > { %v2145_v42 = vpop.xlane.xlu1 %2144 }
 0xa5d   : > { %v2159_v23 = vmul.f32 0.03125, %v2145_v42 }
 0xa5e   : > { %v2142_v24 = vpop.xlane.xlu0 %2141 }
 0xa5f   : > { %v3913_v57 = vsub.f32 %v2135_v43, %v2159_v23  ;;  %v2158_v60 = vmul.f32 0.03125, %v2142_v24  ;;  %v2378_v43 = vld [vmem:[%s3951_s23 + $0x68] sm:$0xff] }
 0xa60   : > { %3159 = vmatprep.subr.mxu0 %v2378_v43 }
 0xa61   : > { %v3915_v27 = vsub.f32 %v2134_v45, %v2158_v60  ;;  %v2171_v8 = vmul.f32 %v3913_v57, %v3913_v57  ;;  %3160 = vmatpush3.msra.mxu0 %v2378_v43  ;;  %v2374_v45 = vld [vmem:[%s3951_s23 + $0x48] sm:$0xff]  ;;  %v2245_v43 = vrot.slane %v3315_v30, %v2244_v41 }
 0xa62   : > { %3161 = vmatprep.subr.mxu0 %v2377_v58 }
 0xa63   : > { %v2148_v28 = vpop.xlane.xlu0 %2147  ;;  %v2179_v13 = vsel %vm666_vm1, %v2171_v8, 0.0  ;;  %v2170_v3 = vmul.f32 %v3915_v27, %v3915_v27  ;;  %3162 = vmatpush3.msra.mxu0 %v2377_v58 }
 0xa64   : > { %v2160_v16 = vmul.f32 0.03125, %v2148_v28  ;;  %2180 = vadd.xlane.f32.xlu0 %v2179_v13  ;;  %3163 = vmatprep.subr.mxu0 %v2376_v6  ;;  %v2221_v13 = vrot.slane %v3891_v61, %v3513_v44 }
 0xa65   : > { %v2176_v17 = vsel %vm666_vm1, %v2170_v3, 0.0  ;;  %3164 = vmatpush3.msra.mxu0 %v2376_v6 }
 0xa66   : > { %v3923_v56 = vsub.f32 %v2136_v51, %v2160_v16  ;;  %2177 = vadd.xlane.f32.xlu1 %v2176_v17  ;;  %3165 = vmatprep.subr.mxu0 %v2375_v20 }
 0xa67   : > { %v2151_v14 = vpop.xlane.xlu0 %2150  ;;  %v2154_v4 = vpop.xlane.xlu1 %2153  ;;  %3166 = vmatpush3.msra.mxu0 %v2375_v20 }
 0xa68   : > { %v2161_v31 = vmul.f32 0.03125, %v2151_v14  ;;  %v2162_v32 = vmul.f32 0.03125, %v2154_v4  ;;  %v2172_v2 = vmul.f32 %v3923_v56, %v3923_v56  ;;  %3167 = vmatprep.subr.mxu0 %v2374_v45 }
 0xa69   : > { %3168 = vmatpush3.msra.mxu0 %v2374_v45 }
 0xa6a   : > { %v3927_v22 = vsub.f32 %v2137_v63, %v2161_v31  ;;  %v3929_v35 = vsub.f32 %v2138_v48, %v2162_v32  ;;  %v2182_v33 = vsel %vm666_vm1, %v2172_v2, 0.0  ;;  %3169 = vmatprep.subr.mxu0 %v2373_v49 }
 0xa6b   : > { %v2157_v34 = vpop.xlane.xlu0 %2156  ;;  %2183 = vadd.xlane.f32.xlu1 %v2182_v33  ;;  %3170 = vmatpush3.msra.mxu0 %v2373_v49 }
 0xa6c   : > { %v2163_v55 = vmul.f32 0.03125, %v2157_v34  ;;  %v2173_v36 = vmul.f32 %v3927_v22, %v3927_v22  ;;  %v2174_v37 = vmul.f32 %v3929_v35, %v3929_v35  ;;  %3171 = vmatprep.subr.mxu0 %v2372_v7 }
 0xa6d   : > { %3172 = vmatpush3.msra.mxu0 %v2372_v7 }
 0xa6e   : > { %v3936_v38 = vsub.f32 %v2139_v21, %v2163_v55  ;;  %v2185_v15 = vsel %vm666_vm1, %v2173_v36, 0.0  ;;  %v2188_v26 = vsel %vm666_vm1, %v2174_v37, 0.0  ;;  %3173 = vmatprep.subr.mxu0 %v2371_v5 }
 0xa6f   : > { %2186 = vadd.xlane.f32.xlu0 %v2185_v15  ;;  %2189 = vadd.xlane.f32.xlu1 %v2188_v26 }
 0xa70   : > { %v2175_v25 = vmul.f32 %v3936_v38, %v3936_v38  ;;  %3174 = vmatpush3.msra.mxu0 %v2371_v5 }
 0xa71   : > { %3175 = vmatprep.subr.mxu0 %v2370_v47 }
 0xa72   : > { %v2191_v62 = vsel %vm666_vm1, %v2175_v25, 0.0  ;;  %3176 = vmatpush3.msra.mxu0 %v2370_v47 }
 0xa73   : > { %2192 = vadd.xlane.f32.xlu0 %v2191_v62  ;;  %3177 = vmatprep.subr.mxu0 %v2369_v50 }
 0xa74   : > { %3178 = vmatpush3.msra.mxu0 %v2369_v50 }
 0xa75   : > { %3179 = vmatprep.subr.mxu0 %v2368_v18 }
 0xa76   : > { %3180 = vmatpush3.msra.mxu0 %v2368_v18 }
 0xa77   : > { %3181 = vmatprep.subr.mxu0 %v2367_v39 }
 0xa78   : > { %3182 = vmatpush3.msra.mxu0 %v2367_v39 }
 0xaed   : > { %v2181_v51 = vpop.xlane.xlu0 %2180 }
 0xaee   : > { %v2195_v52 = vmul.f32 0.03125, %v2181_v51 }
 0xaef   : > { %v2178_v54 = vpop.xlane.xlu1 %2177 }
 0xaf0   : > { %v2201_v59 = vadd.f32 1e-05, %v2195_v52  ;;  %v2194_v46 = vmul.f32 0.03125, %v2178_v54 }
 0xaf2   : > { %3290 = vrsqrt.f32 %v2201_v59  ;;  %v2200_v63 = vadd.f32 1e-05, %v2194_v46 }
 0xaf4   : > { %3292 = vrsqrt.f32 %v2200_v63  ;;  %v2184_v48 = vpop.xlane.xlu1 %2183 }
 0xaf5   : > { %v2196_v0 = vmul.f32 0.03125, %v2184_v48 }
 0xaf7   : > { %v2202_v29 = vadd.f32 1e-05, %v2196_v0 }
 0xaf8   : > { %v2187_v21 = vpop.xlane.xlu0 %2186  ;;  %v2190_v53 = vpop.xlane.xlu1 %2189 }
 0xaf9   : > { %3294 = vrsqrt.f32 %v2202_v29  ;;  %v2197_v42 = vmul.f32 0.03125, %v2187_v21  ;;  %v2198_v23 = vmul.f32 0.03125, %v2190_v53 }
 0xafb   : > { %v2203_v24 = vadd.f32 1e-05, %v2197_v42  ;;  %v2204_v60 = vadd.f32 1e-05, %v2198_v23 }
 0xafc   : > { %v2193_v8 = vpop.xlane.xlu0 %2192 }
 0xafd   : > { %3296 = vrsqrt.f32 %v2203_v24  ;;  %v2199_v28 = vmul.f32 0.03125, %v2193_v8 }
 0xafe   : > { %3298 = vrsqrt.f32 %v2204_v60 }
 0xaff   : > { %v3291_v3 = vpop.eup %3290  ;;  %v2205_v16 = vadd.f32 1e-05, %v2199_v28 }
 0xb00   : > { %v2213_v17 = vmul.f32 %v3291_v3, %v3913_v57 }
 0xb01   : > { %v3293_v14 = vpop.eup %3292  ;;  %3300 = vrsqrt.f32 %v2205_v16 }
 0xb02   : > { %v2223_v4 = vmul.f32 %v2221_v13, %v2213_v17  ;;  %v2212_v31 = vmul.f32 %v3293_v14, %v3915_v27 }
 0xb04   : > { %v2222_v32 = vmul.f32 %v2221_v13, %v2212_v31  ;;  %v3970_v2 = vadd.f32 %v3419_v9, %v2223_v4 }
 0xb06   : > { %v3295_v33 = vpop.eup %3294  ;;  %v3973_v34 = vadd.f32 %v3419_v9, %v2222_v32 }
 0xb07   : > { %v2214_v44 = vmul.f32 %v3295_v33, %v3923_v56 }
 0xb08   : > { %3146 = vmatprep.mubr.msk.f32.mxu1 %vm666_vm1, %v3973_v34 }
 0xb09   : > { %3147 = vmatmul.mubr.msk.f32.vlgmr.msra.gmra.mxu1 %vm666_vm1, %v3970_v2  ;;  %v2224_v61 = vmul.f32 %v2221_v13, %v2214_v44 }
 0xb0a   : > { %v3297_v57 = vpop.eup %3296 }
 0xb0b   : > { %v3299_v55 = vpop.eup %3298  ;;  %v3981_v27 = vadd.f32 %v3419_v9, %v2224_v61  ;;  %v2215_v36 = vmul.f32 %v3297_v57, %v3927_v22 }
 0xb0c   : > { %v2216_v37 = vmul.f32 %v3299_v55, %v3929_v35 }
 0xb0d   : > { %3149 = vmatprep.mubr.msk.f32.mxu1 %vm666_vm1, %v3981_v27  ;;  %v2225_v56 = vmul.f32 %v2221_v13, %v2215_v36 }
 0xb0e   : > { %v3301_v15 = vpop.eup %3300  ;;  %v2226_v26 = vmul.f32 %v2221_v13, %v2216_v37 }
 0xb0f   : > { %v2235_v25 = vadd.f32 %v3419_v9, %v2225_v56  ;;  %v2217_v62 = vmul.f32 %v3301_v15, %v3936_v38  ;;  %v2366_v38 = vld [vmem:[%s3951_s23 + $0x8] sm:$0xff] }
 0xb10   : > { %v3990_v19 = vadd.f32 %v3419_v9, %v2226_v26  ;;  %3183 = vmatprep.subr.mxu0 %v2366_v38 }
 0xb11   : > { %3150 = vmatmul.mubr.msk.f32.gmra.mxu1 %vm666_vm1, %v2235_v25  ;;  %v2227_v22 = vmul.f32 %v2221_v13, %v2217_v62  ;;  %3184 = vmatpush3.msra.mxu0 %v2366_v38 }
 0xb12   : > { %3152 = vmatprep.mubr.msk.f32.mxu1 %vm666_vm1, %v3990_v19  ;;  %3185 = vmatprep.subr.mxu0 %v2365_v40 }
 0xb13   : > { %v2237_v35 = vadd.f32 %v3419_v9, %v2227_v22  ;;  %3186 = vmatpush3.msra.mxu0 %v2365_v40 }
 0xb15   : > { %3153 = vmatmul.mubr.msk.f32.gmra.mxu1 %vm666_vm1, %v2237_v35 }
 0xbc9   : > { %v3148_v58 = vpop.f32.mrf.mxu1 }
 0xbca   : > { %v2336_v9 = vadd.f32 %v3148_v58, %v2245_v43 }
 0xbcb   : > { %v2330_v6 = vpop.f32.mrf.mxu1 }
 0xbcc   : > { %v2331_v20 = vadd.f32 %v2330_v6, %v2245_v43  ;;  %v2360_v49 = vmax.f32 %v2336_v9, 0.0 }
 0xbce   : > { %v2359_v45 = vmax.f32 %v2331_v20, 0.0 }
 0xbd0   : > { %3187 = vmatprep.mubr.f32.mxu0 %v2359_v45 }
 0xbd1   : > { %v3151_v7 = vpop.f32.mrf.mxu1  ;;  %3188 = vmatmul.mubr.f32.vlgmr.msra.gmra.mxu0 %v2360_v49 }
 0xbd2   : > { %v2346_v5 = vadd.f32 %v3151_v7, %v2245_v43 }
 0xbd3   : > { %v2340_v47 = vpop.f32.mrf.mxu1 }
 0xbd4   : > { %v2341_v50 = vadd.f32 %v2340_v47, %v2245_v43  ;;  %v2362_v54 = vmax.f32 %v2346_v5, 0.0 }
 0xbd5   : > { %v3154_v51 = vpop.f32.mrf.mxu1 }
 0xbd6   : > { %v2361_v52 = vmax.f32 %v2341_v50, 0.0  ;;  %v2356_v59 = vadd.f32 %v3154_v51, %v2245_v43 }
 0xbd7   : > { %v2350_v46 = vpop.f32.mrf.mxu1 }
 0xbd8   : > { %v2351_v1 = vadd.f32 %v2350_v46, %v2245_v43  ;;  %3190 = vmatprep.mubr.f32.mxu0 %v2361_v52  ;;  %v2364_v48 = vmax.f32 %v2356_v59, 0.0 }
 0xbd9   : > { %3191 = vmatmul.mubr.f32.gmra.mxu0 %v2362_v54 }
 0xbda   : > { %v2363_v63 = vmax.f32 %v2351_v1, 0.0 }
 0xbdc   : > { %3193 = vmatprep.mubr.f32.mxu0 %v2363_v63 }
 0xbdd   : > { %3194 = vmatmul.mubr.f32.gmra.mxu0 %v2364_v48 }
 0xc91   : > { %v3189_v0 = vpop.f32.mrf.mxu0 }
 0xc92   : > { %v2457_v29 = vadd.f32 %v3189_v0, %v3427_v10 }
 0xc93   : > { %v2451_v21 = vpop.f32.mrf.mxu0 }
 0xc94   : > { %v2452_v53 = vadd.f32 %v2451_v21, %v3427_v10  ;;  %v2481_v42 = vadd.f32 %v2457_v29, %v3970_v2 }
 0xc96   : > { %v2480_v23 = vadd.f32 %v2452_v53, %v3973_v34  ;;  %v2489_v24 = vsel %vm666_vm1, %v2481_v42, 0.0 }
 0xc97   : > { %2490 = vadd.xlane.f32.xlu0 %v2489_v24 }
 0xc98   : > { %v2486_v60 = vsel %vm666_vm1, %v2480_v23, 0.0 }
 0xc99   : > { %v3192_v8 = vpop.f32.mrf.mxu0  ;;  %2487 = vadd.xlane.f32.xlu1 %v2486_v60 }
 0xc9a   : > { %v2467_v28 = vadd.f32 %v3192_v8, %v3427_v10 }
 0xc9b   : > { %v2461_v13 = vpop.f32.mrf.mxu0 }
 0xc9c   : > { %v2483_v3 = vadd.f32 %v2467_v28, %v2235_v25  ;;  %v2462_v16 = vadd.f32 %v2461_v13, %v3427_v10 }
 0xc9d   : > { %v3195_v17 = vpop.f32.mrf.mxu0 }
 0xc9e   : > { %v2482_v14 = vadd.f32 %v2462_v16, %v3981_v27  ;;  %v2477_v4 = vadd.f32 %v3195_v17, %v3427_v10  ;;  %v2495_v31 = vsel %vm666_vm1, %v2483_v3, 0.0 }
 0xc9f   : > { %2496 = vadd.xlane.f32.xlu0 %v2495_v31  ;;  %v2471_v32 = vpop.f32.mrf.mxu0 }
 0xca0   : > { %v2485_v2 = vadd.f32 %v2477_v4, %v2237_v35  ;;  %v2472_v33 = vadd.f32 %v2471_v32, %v3427_v10  ;;  %v2492_v34 = vsel %vm666_vm1, %v2482_v14, 0.0 }
 0xca1   : > { %2493 = vadd.xlane.f32.xlu1 %v2492_v34 }
 0xca2   : > { %v2484_v44 = vadd.f32 %v2472_v33, %v3990_v19  ;;  %v2501_v61 = vsel %vm666_vm1, %v2485_v2, 0.0 }
 0xca3   : > { %2502 = vadd.xlane.f32.xlu0 %v2501_v61 }
 0xca4   : > { %v2498_v57 = vsel %vm666_vm1, %v2484_v44, 0.0 }
 0xca5   : > { %2499 = vadd.xlane.f32.xlu1 %v2498_v57 }
 0xd20   : > { %v2491_v55 = vpop.xlane.xlu0 %2490 }
 0xd21   : > { %v2505_v27 = vmul.f32 0.03125, %v2491_v55 }
 0xd22   : > { %v2488_v36 = vpop.xlane.xlu1 %2487 }
 0xd23   : > { %v2511_v37 = vsub.f32 %v2481_v42, %v2505_v27  ;;  %v2504_v56 = vmul.f32 0.03125, %v2488_v36 }
 0xd25   : > { %v2510_v15 = vsub.f32 %v2480_v23, %v2504_v56  ;;  %v2517_v26 = vmul.f32 %v2511_v37, %v2511_v37 }
 0xd27   : > { %v2525_v10 = vsel %vm666_vm1, %v2517_v26, 0.0  ;;  %v2516_v25 = vmul.f32 %v2510_v15, %v2510_v15 }
 0xd28   : > { %v2497_v62 = vpop.xlane.xlu0 %2496  ;;  %2526 = vadd.xlane.f32.xlu0 %v2525_v10 }
 0xd29   : > { %v2507_v22 = vmul.f32 0.03125, %v2497_v62  ;;  %v2522_v19 = vsel %vm666_vm1, %v2516_v25, 0.0 }
 0xd2a   : > { %v2494_v35 = vpop.xlane.xlu1 %2493  ;;  %2523 = vadd.xlane.f32.xlu1 %v2522_v19 }
 0xd2b   : > { %v2513_v18 = vsub.f32 %v2483_v3, %v2507_v22  ;;  %v2506_v39 = vmul.f32 0.03125, %v2494_v35 }
 0xd2c   : > { %v2503_v38 = vpop.xlane.xlu0 %2502 }
 0xd2d   : > { %v2512_v40 = vsub.f32 %v2482_v14, %v2506_v39  ;;  %v2509_v41 = vmul.f32 0.03125, %v2503_v38  ;;  %v2519_v30 = vmul.f32 %v2513_v18, %v2513_v18 }
 0xd2e   : > { %v2500_v43 = vpop.xlane.xlu1 %2499 }
 0xd2f   : > { %v2515_v58 = vsub.f32 %v2485_v2, %v2509_v41  ;;  %v2508_v9 = vmul.f32 0.03125, %v2500_v43  ;;  %v2531_v6 = vsel %vm666_vm1, %v2519_v30, 0.0  ;;  %v2518_v20 = vmul.f32 %v2512_v40, %v2512_v40 }
 0xd30   : > { %2532 = vadd.xlane.f32.xlu0 %v2531_v6 }
 0xd31   : > { %v2514_v45 = vsub.f32 %v2484_v44, %v2508_v9  ;;  %v2528_v49 = vsel %vm666_vm1, %v2518_v20, 0.0  ;;  %v2521_v7 = vmul.f32 %v2515_v58, %v2515_v58 }
 0xd32   : > { %2529 = vadd.xlane.f32.xlu1 %v2528_v49 }
 0xd33   : > { %v2537_v5 = vsel %vm666_vm1, %v2521_v7, 0.0  ;;  %v2520_v47 = vmul.f32 %v2514_v45, %v2514_v45 }
 0xd34   : > { %2538 = vadd.xlane.f32.xlu0 %v2537_v5 }
 0xd35   : > { %v2534_v50 = vsel %vm666_vm1, %v2520_v47, 0.0 }
 0xd36   : > { %2535 = vadd.xlane.f32.xlu1 %v2534_v50 }
 0xdb1   : > { %v2527_v51 = vpop.xlane.xlu0 %2526 }
 0xdb2   : > { %v2541_v52 = vmul.f32 0.03125, %v2527_v51 }
 0xdb3   : > { %v2524_v54 = vpop.xlane.xlu1 %2523 }
 0xdb4   : > { %v2547_v59 = vadd.f32 1e-05, %v2541_v52  ;;  %v2540_v46 = vmul.f32 0.03125, %v2524_v54 }
 0xdb6   : > { %3302 = vrsqrt.f32 %v2547_v59  ;;  %v2546_v1 = vadd.f32 1e-05, %v2540_v46 }
 0xdb8   : > { %3304 = vrsqrt.f32 %v2546_v1 }
 0xdb9   : > { %v2533_v63 = vpop.xlane.xlu0 %2532 }
 0xdba   : > { %v2543_v48 = vmul.f32 0.03125, %v2533_v63 }
 0xdbb   : > { %v2530_v0 = vpop.xlane.xlu1 %2529 }
 0xdbc   : > { %v2549_v29 = vadd.f32 1e-05, %v2543_v48  ;;  %v2542_v21 = vmul.f32 0.03125, %v2530_v0 }
 0xdbd   : > { %v2539_v53 = vpop.xlane.xlu0 %2538 }
 0xdbe   : > { %3306 = vrsqrt.f32 %v2549_v29  ;;  %v2548_v42 = vadd.f32 1e-05, %v2542_v21  ;;  %v2545_v23 = vmul.f32 0.03125, %v2539_v53 }
 0xdbf   : > { %v2536_v24 = vpop.xlane.xlu1 %2535 }
 0xdc0   : > { %3308 = vrsqrt.f32 %v2548_v42  ;;  %v2551_v60 = vadd.f32 1e-05, %v2545_v23  ;;  %v2544_v8 = vmul.f32 0.03125, %v2536_v24 }
 0xdc2   : > { %3310 = vrsqrt.f32 %v2551_v60  ;;  %v2550_v28 = vadd.f32 1e-05, %v2544_v8 }
 0xdc3   : > { %v3303_v13 = vpop.eup %3302 }
 0xdc4   : > { %v2559_v3 = vmul.f32 %v3303_v13, %v2511_v37  ;;  %3312 = vrsqrt.f32 %v2550_v28 }
 0xdc5   : > { %v3305_v16 = vpop.eup %3304 }
 0xdc6   : > { %v2569_v17 = vmul.f32 %v3431_v11, %v2559_v3  ;;  %v2558_v14 = vmul.f32 %v3305_v16, %v2510_v15 }
 0xdc8   : > { %v2579_v4 = vadd.f32 %v3435_v12, %v2569_v17  ;;  %v2568_v31 = vmul.f32 %v3431_v11, %v2558_v14 }
 0xdca   : > { %2585 = vst.msk [vmem:[%s536_s26 + $0x8] sm:$0xff] %vm666_vm1, %v2579_v4  ;;  %v2578_v32 = vadd.f32 %v3435_v12, %v2568_v31 }
 0xdcb   : > { %v3307_v2 = vpop.eup %3306 }
 0xdcc   : > { %2584 = vst.msk [vmem:[%s536_s26] sm:$0xff] %vm666_vm1, %v2578_v32  ;;  %v2561_v33 = vmul.f32 %v3307_v2, %v2513_v18 }
 0xdcd   : > { %v3309_v34 = vpop.eup %3308 }
 0xdce   : > { %v2571_v44 = vmul.f32 %v3431_v11, %v2561_v33  ;;  %v2560_v61 = vmul.f32 %v3309_v34, %v2512_v40 }
 0xdcf   : > { %v3311_v57 = vpop.eup %3310 }
 0xdd0   : > { %v2581_v55 = vadd.f32 %v3435_v12, %v2571_v44  ;;  %v2570_v27 = vmul.f32 %v3431_v11, %v2560_v61  ;;  %v2563_v36 = vmul.f32 %v3311_v57, %v2515_v58 }
 0xdd1   : > { %v3313_v37 = vpop.eup %3312 }
 0xdd2   : > { %2587 = vst.msk [vmem:[%s536_s26 + $0x18] sm:$0xff] %vm666_vm1, %v2581_v55  ;;  %v2580_v56 = vadd.f32 %v3435_v12, %v2570_v27  ;;  %v2573_v15 = vmul.f32 %v3431_v11, %v2563_v36  ;;  %v2562_v26 = vmul.f32 %v3313_v37, %v2514_v45 }
 0xdd4   : > { %2586 = vst.msk [vmem:[%s536_s26 + $0x10] sm:$0xff] %vm666_vm1, %v2580_v56  ;;  %v2583_v10 = vadd.f32 %v3435_v12, %v2573_v15  ;;  %v2572_v25 = vmul.f32 %v3431_v11, %v2562_v26 }
 0xdd6   : > { %2589 = vst.msk [vmem:[%s536_s26 + $0x28] sm:$0xff] %vm666_vm1, %v2583_v10  ;;  %v2582_v62 = vadd.f32 %v3435_v12, %v2572_v25 }
 0xdd8   : > { %2588 = vst.msk [vmem:[%s536_s26 + $0x20] sm:$0xff] %vm666_vm1, %v2582_v62 }
 0xdd9 PF: > { %s20_s13 = sadd.s32 1, %s3322_s13  }
 0xdda   : > { %p17_p4 = scmp.ge.s32.totalorder %s20_s13, 6  }
 0xddc   :  { %19 = sbr.rel (!%p17_p4) target bundleno = 1 (0x1), region = 117 }

</bundles_post_ra>
